<compile_context>
chip_gen: v7x
topology: tpu7x:2x2x1
jax: 0.10.0
libtpu: 0.0.40
codegen_flags: <defaults>
</compile_context>

<pallas_src>
import functools

import jax
import jax.numpy as jnp
from jax.experimental import pallas as pl
from jax.experimental.pallas import tpu as pltpu

_LANE = 128      # lane tile
_SUBLANE = 8     # sublane tile
_OUT_PAD = 128   # lane-dense padded fc output width


def _round_up(n, m):
    return ((n + m - 1) // m) * m


def _gru_fused_kernel(x_ref, wi_ref, wh_ref, bi_ref, bh_ref, wfc_ref, bfc_ref,
                      out_ref, gx_ref, *, seq_len, b_pad, h_pad):
    """x_ref: (T*B_pad, I_pad); wi: (I_pad, 3*H_pad); wh: (H_pad, 3*H_pad);
    bi/bh: (1, 3*H_pad); wfc: (H_pad, 128); bfc: (1, 128);
    out: (B_pad, 128); gx_ref: VMEM scratch (T*B_pad, 3*H_pad)."""
    # ---- prologue: all input projections hoisted out of the recurrence ----
    # One well-shaped matmul instead of 3 tiny ones per timestep.
    gx_ref[...] = (
        jnp.dot(x_ref[...], wi_ref[...], preferred_element_type=jnp.float32)
        + bi_ref[...]          # [b_ir+b_hr | b_iz+b_hz | b_in]
    )

    # Hoisted bias broadcast (JAX does not CSE broadcast_in_dim in the loop).
    # bh = [0 | 0 | b_hn]  -- b_hn must stay on the hidden path because of
    # the r * (W_hn h + b_hn) term.
    bh_b = jnp.broadcast_to(bh_ref[...], (b_pad, 3 * h_pad))

    def step(t, h_prev):
        start = pl.multiple_of(t * b_pad, b_pad)
        gx = gx_ref[pl.ds(start, b_pad), :]                    # (B, 3H) precomputed
        # single fused hidden matmul: (B, H) @ (H, 3H)
        gh = (jnp.dot(h_prev, wh_ref[...], preferred_element_type=jnp.float32)
              + bh_b)
        r = jax.nn.sigmoid(gx[:, :h_pad] + gh[:, :h_pad])
        z = jax.nn.sigmoid(gx[:, h_pad:2 * h_pad] + gh[:, h_pad:2 * h_pad])
        n = jnp.tanh(gx[:, 2 * h_pad:] + r * gh[:, 2 * h_pad:])
        return (1.0 - z) * n + z * h_prev

    h0 = jnp.zeros((b_pad, h_pad), jnp.float32)
    # Hidden state carried in vregs; unrolled so LLO can schedule across steps.
    h_last = jax.lax.fori_loop(0, seq_len, step, h0, unroll=True)

    # dropout(p=0.5) is identity in eval mode.
    # TODO(synk): training-mode dropout (random mask) intentionally omitted.
    # fc weight is padded to 128 output lanes so this store is lane-dense;
    # the wrapper slices column 0.
    out_ref[...] = jnp.exp(
        jnp.dot(h_last, wfc_ref[...], preferred_element_type=jnp.float32)
        + bfc_ref[...]
    )


def _pad2d(a, rows, cols):
    out = jnp.zeros((rows, cols), jnp.float32)
    return out.at[: a.shape[0], : a.shape[1]].set(a.astype(jnp.float32))


def _pack_params(p, input_size, hidden_size):
    """PyTorch-layout params -> fused, transposed, tile-padded kernel params."""
    H, I = hidden_size, input_size
    I_pad = _round_up(max(I, 1), _LANE)
    H_pad = _round_up(max(H, 1), _LANE)

    w_ih, w_hh = p["w_ih"], p["w_hh"]          # (3H, I), (3H, H), gate order [r,z,n]
    b_ih, b_hh = p["b_ih"], p["b_hh"]          # (3H,), (3H,)
    w_fc, b_fc = p["w_fc"], p["b_fc"]          # (1, H), (1,)

    wir, wiz, win = w_ih[:H], w_ih[H:2 * H], w_ih[2 * H:]
    whr, whz, whn = w_hh[:H], w_hh[H:2 * H], w_hh[2 * H:]
    bir, biz, bin_ = b_ih[:H], b_ih[H:2 * H], b_ih[2 * H:]
    bhr, bhz, bhn = b_hh[:H], b_hh[H:2 * H], b_hh[2 * H:]

    # Each gate occupies its own H_pad-wide lane block so the kernel can slice
    # at multiples of 128.
    wi_all = jnp.concatenate(
        [_pad2d(wir.T, I_pad, H_pad), _pad2d(wiz.T, I_pad, H_pad),
         _pad2d(win.T, I_pad, H_pad)], axis=1)                    # (I_pad, 3*H_pad)
    wh_all = jnp.concatenate(
        [_pad2d(whr.T, H_pad, H_pad), _pad2d(whz.T, H_pad, H_pad),
         _pad2d(whn.T, H_pad, H_pad)], axis=1)                    # (H_pad, 3*H_pad)

    bi_all = jnp.concatenate(
        [_pad2d((bir + bhr)[None, :], 1, H_pad),
         _pad2d((biz + bhz)[None, :], 1, H_pad),
         _pad2d(bin_[None, :], 1, H_pad)], axis=1)                # (1, 3*H_pad)
    bh_all = jnp.concatenate(
        [jnp.zeros((1, H_pad), jnp.float32),
         jnp.zeros((1, H_pad), jnp.float32),
         _pad2d(bhn[None, :], 1, H_pad)], axis=1)                 # (1, 3*H_pad)

    wfc_pad = _pad2d(w_fc.T, H_pad, _OUT_PAD)                     # (H_pad, 128)
    bfc_pad = _pad2d(b_fc[None, :], 1, _OUT_PAD)                  # (1, 128)
    return wi_all, wh_all, bi_all, bh_all, wfc_pad, bfc_pad, I_pad, H_pad


@jax.jit
def gru_model_n_forward(x, params):
    """x: (B, T, I) float32 (batch_first). Returns (B, 1) == exp(fc(gru(x)[:, -1]))."""
    B, T, I = x.shape
    assert T >= 1, "sequence length must be >= 1"
    H = params["w_hh"].shape[1]

    (wi_all, wh_all, bi_all, bh_all, wfc_pad, bfc_pad,
     I_pad, H_pad) = _pack_params(params, I, H)

    B_pad = _round_up(max(B, 1), _SUBLANE)

    # (B, T, I) -> (T, B_pad, I_pad) zero-padded -> flat (T*B_pad, I_pad).
    x_tbi = jnp.transpose(x, (1, 0, 2))
    x_pad = jnp.zeros((T, B_pad, I_pad), jnp.float32).at[:, :B, :I].set(x_tbi)
    x_flat = x_pad.reshape(T * B_pad, I_pad)

    kernel = functools.partial(
        _gru_fused_kernel, seq_len=T, b_pad=B_pad, h_pad=H_pad)

    vmem_spec = pl.BlockSpec(memory_space=pltpu.MemorySpace.VMEM)

    out_pad = pl.pallas_call(
        kernel,
        out_shape=jax.ShapeDtypeStruct((B_pad, _OUT_PAD), jnp.float32),
        in_specs=[vmem_spec] * 7,
        out_specs=vmem_spec,
        scratch_shapes=[pltpu.VMEM((T * B_pad, 3 * H_pad), jnp.float32)],
        compiler_params=pltpu.CompilerParams(
            vmem_limit_bytes=32 * 1024 * 1024,   # explicit, fits v7x's budget
        ),
    )(x_flat, wi_all, wh_all, bi_all, bh_all, wfc_pad, bfc_pad)

    return out_pad[:B, :1]


def init_params(key, input_size, hidden_size):
    """PyTorch-shaped params: uniform(-1/sqrt(H), 1/sqrt(H)), gate order [r,z,n]."""
    H, I = hidden_size, input_size
    k = 1.0 / jnp.sqrt(jnp.float32(H))
    keys = jax.random.split(key, 6)
    u = lambda kk, shape: jax.random.uniform(kk, shape, jnp.float32, -k, k)
    return dict(
        w_ih=u(keys[0], (3 * H, I)),
        w_hh=u(keys[1], (3 * H, H)),
        b_ih=u(keys[2], (3 * H,)),
        b_hh=u(keys[3], (3 * H,)),
        w_fc=u(keys[4], (1, H)),
        b_fc=u(keys[5], (1,)),
    )


def _reference_forward(x, p):
    """Pure-JAX reference of the PyTorch GRUModel_n forward (eval mode)."""
    B, T, I = x.shape
    H = p["w_hh"].shape[1]
    wir, wiz, win = p["w_ih"][:H], p["w_ih"][H:2 * H], p["w_ih"][2 * H:]
    whr, whz, whn = p["w_hh"][:H], p["w_hh"][H:2 * H], p["w_hh"][2 * H:]
    bir, biz, bin_ = p["b_ih"][:H], p["b_ih"][H:2 * H], p["b_ih"][2 * H:]
    bhr, bhz, bhn = p["b_hh"][:H], p["b_hh"][H:2 * H], p["b_hh"][2 * H:]
    h = jnp.zeros((B, H), jnp.float32)
    for t in range(T):
        xt = x[:, t, :]
        r = jax.nn.sigmoid(xt @ wir.T + bir + h @ whr.T + bhr)
        z = jax.nn.sigmoid(xt @ wiz.T + biz + h @ whz.T + bhz)
        n = jnp.tanh(xt @ win.T + bin_ + r * (h @ whn.T + bhn))
        h = (1.0 - z) * n + z * h
    return jnp.exp(h @ p["w_fc"].T + p["b_fc"][None, :])


if __name__ == "__main__":
    B, T, I, H = 2, 8, 4, 32

    key = jax.random.PRNGKey(0)
    kx, kp = jax.random.split(key)
    x = jax.random.normal(kx, (B, T, I), jnp.float32)
    params = init_params(kp, I, H)

    out = gru_model_n_forward(x, params)
    out = jax.block_until_ready(out)

    ref = _reference_forward(x, params)
    assert out.shape == (B, 1)
    assert jnp.allclose(out, ref, atol=1e-4, rtol=1e-4), (out, ref)

    print("KERNEL_OK")
</pallas_src>

<mosaic_0001>
module attributes {stable_mosaic.version = 11 : i64} {
  func.func @_gru_fused_kernel(%arg0: memref<64x128xf32, #tpu.memory_space<vmem>>, %arg1: memref<128x384xf32, #tpu.memory_space<vmem>>, %arg2: memref<128x384xf32, #tpu.memory_space<vmem>>, %arg3: memref<1x384xf32, #tpu.memory_space<vmem>>, %arg4: memref<1x384xf32, #tpu.memory_space<vmem>>, %arg5: memref<128x128xf32, #tpu.memory_space<vmem>>, %arg6: memref<1x128xf32, #tpu.memory_space<vmem>>, %arg7: memref<8x128xf32, #tpu.memory_space<vmem>>, %arg8: memref<64x384xf32, #tpu.memory_space<vmem>>) attributes {dimension_semantics = [], scalar_prefetch = 0 : i64, scratch_operands = 1 : i64, tpu.core_type = #tpu.core_type<tc>} {
    %c0 = arith.constant 0 : index
    %c0_0 = arith.constant 0 : index
    %0 = vector.load %arg0[%c0, %c0_0] : memref<64x128xf32, #tpu.memory_space<vmem>>, vector<64x128xf32>
    %c0_1 = arith.constant 0 : index
    %c0_2 = arith.constant 0 : index
    %1 = vector.load %arg1[%c0_1, %c0_2] : memref<128x384xf32, #tpu.memory_space<vmem>>, vector<128x384xf32>
    %cst = arith.constant dense<0.000000e+00> : vector<64x384xf32>
    %2 = tpu.matmul %0, %1, %cst {dimension_numbers = #tpu.dot_dimension_numbers<[1], [0], [0], [1], [0, 0, 1, 1], [], []>} : vector<64x128xf32>, vector<128x384xf32>, vector<64x384xf32> -> vector<64x384xf32>
    %c0_3 = arith.constant 0 : index
    %c0_4 = arith.constant 0 : index
    %3 = vector.load %arg3[%c0_3, %c0_4] : memref<1x384xf32, #tpu.memory_space<vmem>>, vector<1x384xf32>
    %4 = vector.broadcast %3 : vector<1x384xf32> to vector<64x384xf32>
    %5 = arith.addf %2, %4 : vector<64x384xf32>
    %c0_5 = arith.constant 0 : index
    %c0_6 = arith.constant 0 : index
    %6 = vector.load %arg8[%c0_5, %c0_6] : memref<64x384xf32, #tpu.memory_space<vmem>>, vector<64x384xf32>
    tpu.vector_store %arg8[%c0_5, %c0_6], %5 {strides = array<i32>} : memref<64x384xf32, #tpu.memory_space<vmem>>, vector<64x384xf32>,
    %c0_7 = arith.constant 0 : index
    %c0_8 = arith.constant 0 : index
    %7 = vector.load %arg4[%c0_7, %c0_8] : memref<1x384xf32, #tpu.memory_space<vmem>>, vector<1x384xf32>
    %8 = vector.shape_cast %7 : vector<1x384xf32> to vector<1x384xf32>
    %9 = vector.broadcast %8 : vector<1x384xf32> to vector<8x384xf32>
    %cst_9 = arith.constant 0.000000e+00 : f32
    %10 = vector.broadcast %cst_9 : f32 to vector<8x128xf32>
    %c0_i32 = arith.constant 0 : i32
    %c8_i32 = arith.constant 8 : i32
    %11 = arith.muli %c0_i32, %c8_i32 : i32
    %12 = tpu.assume_multiple %11, 8 : i32
    %13 = arith.index_cast %12 : i32 to index
    %c0_10 = arith.constant 0 : index
    %14 = vector.load %arg8[%13, %c0_10] : memref<64x384xf32, #tpu.memory_space<vmem>>, vector<8x384xf32>
    %c0_11 = arith.constant 0 : index
    %c0_12 = arith.constant 0 : index
    %15 = vector.load %arg2[%c0_11, %c0_12] : memref<128x384xf32, #tpu.memory_space<vmem>>, vector<128x384xf32>
    %cst_13 = arith.constant dense<0.000000e+00> : vector<8x384xf32>
    %16 = tpu.matmul %10, %15, %cst_13 {dimension_numbers = #tpu.dot_dimension_numbers<[1], [0], [0], [1], [0, 0, 1, 1], [], []>} : vector<8x128xf32>, vector<128x384xf32>, vector<8x384xf32> -> vector<8x384xf32>
    %17 = arith.addf %16, %9 : vector<8x384xf32>
    %18 = vector.extract_strided_slice %14 {offsets = [0, 0], sizes = [8, 128], strides = [1, 1]} : vector<8x384xf32> to vector<8x128xf32>
    %19 = vector.extract_strided_slice %17 {offsets = [0, 0], sizes = [8, 128], strides = [1, 1]} : vector<8x384xf32> to vector<8x128xf32>
    %20 = arith.addf %18, %19 : vector<8x128xf32>
    %21 = arith.negf %20 : vector<8x128xf32>
    %22 = math.exp %21 : vector<8x128xf32>
    %cst_14 = arith.constant 1.000000e+00 : f32
    %23 = vector.broadcast %cst_14 : f32 to vector<8x128xf32>
    %24 = arith.addf %23, %22 : vector<8x128xf32>
    %25 = arith.divf %23, %24 : vector<8x128xf32>
    %26 = vector.extract_strided_slice %14 {offsets = [0, 128], sizes = [8, 128], strides = [1, 1]} : vector<8x384xf32> to vector<8x128xf32>
    %27 = vector.extract_strided_slice %17 {offsets = [0, 128], sizes = [8, 128], strides = [1, 1]} : vector<8x384xf32> to vector<8x128xf32>
    %28 = arith.addf %26, %27 : vector<8x128xf32>
    %29 = arith.negf %28 : vector<8x128xf32>
    %30 = math.exp %29 : vector<8x128xf32>
    %cst_15 = arith.constant 1.000000e+00 : f32
    %31 = vector.broadcast %cst_15 : f32 to vector<8x128xf32>
    %32 = arith.addf %31, %30 : vector<8x128xf32>
    %33 = arith.divf %31, %32 : vector<8x128xf32>
    %34 = vector.extract_strided_slice %14 {offsets = [0, 256], sizes = [8, 128], strides = [1, 1]} : vector<8x384xf32> to vector<8x128xf32>
    %35 = vector.extract_strided_slice %17 {offsets = [0, 256], sizes = [8, 128], strides = [1, 1]} : vector<8x384xf32> to vector<8x128xf32>
    %36 = arith.mulf %25, %35 : vector<8x128xf32>
    %37 = arith.addf %34, %36 : vector<8x128xf32>
    %38 = math.tanh %37 : vector<8x128xf32>
    %cst_16 = arith.constant 1.000000e+00 : f32
    %39 = vector.broadcast %cst_16 : f32 to vector<8x128xf32>
    %40 = arith.subf %39, %33 : vector<8x128xf32>
    %41 = arith.mulf %40, %38 : vector<8x128xf32>
    %42 = arith.mulf %33, %10 : vector<8x128xf32>
    %43 = arith.addf %41, %42 : vector<8x128xf32>
    %c1_i32 = arith.constant 1 : i32
    %c8_i32_17 = arith.constant 8 : i32
    %44 = arith.muli %c1_i32, %c8_i32_17 : i32
    %45 = tpu.assume_multiple %44, 8 : i32
    %46 = arith.index_cast %45 : i32 to index
    %c0_18 = arith.constant 0 : index
    %47 = vector.load %arg8[%46, %c0_18] : memref<64x384xf32, #tpu.memory_space<vmem>>, vector<8x384xf32>
    %c0_19 = arith.constant 0 : index
    %c0_20 = arith.constant 0 : index
    %48 = vector.load %arg2[%c0_19, %c0_20] : memref<128x384xf32, #tpu.memory_space<vmem>>, vector<128x384xf32>
    %cst_21 = arith.constant dense<0.000000e+00> : vector<8x384xf32>
    %49 = tpu.matmul %43, %48, %cst_21 {dimension_numbers = #tpu.dot_dimension_numbers<[1], [0], [0], [1], [0, 0, 1, 1], [], []>} : vector<8x128xf32>, vector<128x384xf32>, vector<8x384xf32> -> vector<8x384xf32>
    %50 = arith.addf %49, %9 : vector<8x384xf32>
    %51 = vector.extract_strided_slice %47 {offsets = [0, 0], sizes = [8, 128], strides = [1, 1]} : vector<8x384xf32> to vector<8x128xf32>
    %52 = vector.extract_strided_slice %50 {offsets = [0, 0], sizes = [8, 128], strides = [1, 1]} : vector<8x384xf32> to vector<8x128xf32>
    %53 = arith.addf %51, %52 : vector<8x128xf32>
    %54 = arith.negf %53 : vector<8x128xf32>
    %55 = math.exp %54 : vector<8x128xf32>
    %cst_22 = arith.constant 1.000000e+00 : f32
    %56 = vector.broadcast %cst_22 : f32 to vector<8x128xf32>
    %57 = arith.addf %56, %55 : vector<8x128xf32>
    %58 = arith.divf %56, %57 : vector<8x128xf32>
    %59 = vector.extract_strided_slice %47 {offsets = [0, 128], sizes = [8, 128], strides = [1, 1]} : vector<8x384xf32> to vector<8x128xf32>
    %60 = vector.extract_strided_slice %50 {offsets = [0, 128], sizes = [8, 128], strides = [1, 1]} : vector<8x384xf32> to vector<8x128xf32>
    %61 = arith.addf %59, %60 : vector<8x128xf32>
    %62 = arith.negf %61 : vector<8x128xf32>
    %63 = math.exp %62 : vector<8x128xf32>
    %cst_23 = arith.constant 1.000000e+00 : f32
    %64 = vector.broadcast %cst_23 : f32 to vector<8x128xf32>
    %65 = arith.addf %64, %63 : vector<8x128xf32>
    %66 = arith.divf %64, %65 : vector<8x128xf32>
    %67 = vector.extract_strided_slice %47 {offsets = [0, 256], sizes = [8, 128], strides = [1, 1]} : vector<8x384xf32> to vector<8x128xf32>
    %68 = vector.extract_strided_slice %50 {offsets = [0, 256], sizes = [8, 128], strides = [1, 1]} : vector<8x384xf32> to vector<8x128xf32>
    %69 = arith.mulf %58, %68 : vector<8x128xf32>
    %70 = arith.addf %67, %69 : vector<8x128xf32>
    %71 = math.tanh %70 : vector<8x128xf32>
    %cst_24 = arith.constant 1.000000e+00 : f32
    %72 = vector.broadcast %cst_24 : f32 to vector<8x128xf32>
    %73 = arith.subf %72, %66 : vector<8x128xf32>
    %74 = arith.mulf %73, %71 : vector<8x128xf32>
    %75 = arith.mulf %66, %43 : vector<8x128xf32>
    %76 = arith.addf %74, %75 : vector<8x128xf32>
    %c2_i32 = arith.constant 2 : i32
    %c8_i32_25 = arith.constant 8 : i32
    %77 = arith.muli %c2_i32, %c8_i32_25 : i32
    %78 = tpu.assume_multiple %77, 8 : i32
    %79 = arith.index_cast %78 : i32 to index
    %c0_26 = arith.constant 0 : index
    %80 = vector.load %arg8[%79, %c0_26] : memref<64x384xf32, #tpu.memory_space<vmem>>, vector<8x384xf32>
    %c0_27 = arith.constant 0 : index
    %c0_28 = arith.constant 0 : index
    %81 = vector.load %arg2[%c0_27, %c0_28] : memref<128x384xf32, #tpu.memory_space<vmem>>, vector<128x384xf32>
    %cst_29 = arith.constant dense<0.000000e+00> : vector<8x384xf32>
    %82 = tpu.matmul %76, %81, %cst_29 {dimension_numbers = #tpu.dot_dimension_numbers<[1], [0], [0], [1], [0, 0, 1, 1], [], []>} : vector<8x128xf32>, vector<128x384xf32>, vector<8x384xf32> -> vector<8x384xf32>
    %83 = arith.addf %82, %9 : vector<8x384xf32>
    %84 = vector.extract_strided_slice %80 {offsets = [0, 0], sizes = [8, 128], strides = [1, 1]} : vector<8x384xf32> to vector<8x128xf32>
    %85 = vector.extract_strided_slice %83 {offsets = [0, 0], sizes = [8, 128], strides = [1, 1]} : vector<8x384xf32> to vector<8x128xf32>
    %86 = arith.addf %84, %85 : vector<8x128xf32>
    %87 = arith.negf %86 : vector<8x128xf32>
    %88 = math.exp %87 : vector<8x128xf32>
    %cst_30 = arith.constant 1.000000e+00 : f32
    %89 = vector.broadcast %cst_30 : f32 to vector<8x128xf32>
    %90 = arith.addf %89, %88 : vector<8x128xf32>
    %91 = arith.divf %89, %90 : vector<8x128xf32>
    %92 = vector.extract_strided_slice %80 {offsets = [0, 128], sizes = [8, 128], strides = [1, 1]} : vector<8x384xf32> to vector<8x128xf32>
    %93 = vector.extract_strided_slice %83 {offsets = [0, 128], sizes = [8, 128], strides = [1, 1]} : vector<8x384xf32> to vector<8x128xf32>
    %94 = arith.addf %92, %93 : vector<8x128xf32>
    %95 = arith.negf %94 : vector<8x128xf32>
    %96 = math.exp %95 : vector<8x128xf32>
    %cst_31 = arith.constant 1.000000e+00 : f32
    %97 = vector.broadcast %cst_31 : f32 to vector<8x128xf32>
    %98 = arith.addf %97, %96 : vector<8x128xf32>
    %99 = arith.divf %97, %98 : vector<8x128xf32>
    %100 = vector.extract_strided_slice %80 {offsets = [0, 256], sizes = [8, 128], strides = [1, 1]} : vector<8x384xf32> to vector<8x128xf32>
    %101 = vector.extract_strided_slice %83 {offsets = [0, 256], sizes = [8, 128], strides = [1, 1]} : vector<8x384xf32> to vector<8x128xf32>
    %102 = arith.mulf %91, %101 : vector<8x128xf32>
    %103 = arith.addf %100, %102 : vector<8x128xf32>
    %104 = math.tanh %103 : vector<8x128xf32>
    %cst_32 = arith.constant 1.000000e+00 : f32
    %105 = vector.broadcast %cst_32 : f32 to vector<8x128xf32>
    %106 = arith.subf %105, %99 : vector<8x128xf32>
    %107 = arith.mulf %106, %104 : vector<8x128xf32>
    %108 = arith.mulf %99, %76 : vector<8x128xf32>
    %109 = arith.addf %107, %108 : vector<8x128xf32>
    %c3_i32 = arith.constant 3 : i32
    %c8_i32_33 = arith.constant 8 : i32
    %110 = arith.muli %c3_i32, %c8_i32_33 : i32
    %111 = tpu.assume_multiple %110, 8 : i32
    %112 = arith.index_cast %111 : i32 to index
    %c0_34 = arith.constant 0 : index
    %113 = vector.load %arg8[%112, %c0_34] : memref<64x384xf32, #tpu.memory_space<vmem>>, vector<8x384xf32>
    %c0_35 = arith.constant 0 : index
    %c0_36 = arith.constant 0 : index
    %114 = vector.load %arg2[%c0_35, %c0_36] : memref<128x384xf32, #tpu.memory_space<vmem>>, vector<128x384xf32>
    %cst_37 = arith.constant dense<0.000000e+00> : vector<8x384xf32>
    %115 = tpu.matmul %109, %114, %cst_37 {dimension_numbers = #tpu.dot_dimension_numbers<[1], [0], [0], [1], [0, 0, 1, 1], [], []>} : vector<8x128xf32>, vector<128x384xf32>, vector<8x384xf32> -> vector<8x384xf32>
    %116 = arith.addf %115, %9 : vector<8x384xf32>
    %117 = vector.extract_strided_slice %113 {offsets = [0, 0], sizes = [8, 128], strides = [1, 1]} : vector<8x384xf32> to vector<8x128xf32>
    %118 = vector.extract_strided_slice %116 {offsets = [0, 0], sizes = [8, 128], strides = [1, 1]} : vector<8x384xf32> to vector<8x128xf32>
    %119 = arith.addf %117, %118 : vector<8x128xf32>
    %120 = arith.negf %119 : vector<8x128xf32>
    %121 = math.exp %120 : vector<8x128xf32>
    %cst_38 = arith.constant 1.000000e+00 : f32
    %122 = vector.broadcast %cst_38 : f32 to vector<8x128xf32>
    %123 = arith.addf %122, %121 : vector<8x128xf32>
    %124 = arith.divf %122, %123 : vector<8x128xf32>
    %125 = vector.extract_strided_slice %113 {offsets = [0, 128], sizes = [8, 128], strides = [1, 1]} : vector<8x384xf32> to vector<8x128xf32>
    %126 = vector.extract_strided_slice %116 {offsets = [0, 128], sizes = [8, 128], strides = [1, 1]} : vector<8x384xf32> to vector<8x128xf32>
    %127 = arith.addf %125, %126 : vector<8x128xf32>
    %128 = arith.negf %127 : vector<8x128xf32>
    %129 = math.exp %128 : vector<8x128xf32>
    %cst_39 = arith.constant 1.000000e+00 : f32
    %130 = vector.broadcast %cst_39 : f32 to vector<8x128xf32>
    %131 = arith.addf %130, %129 : vector<8x128xf32>
    %132 = arith.divf %130, %131 : vector<8x128xf32>
    %133 = vector.extract_strided_slice %113 {offsets = [0, 256], sizes = [8, 128], strides = [1, 1]} : vector<8x384xf32> to vector<8x128xf32>
    %134 = vector.extract_strided_slice %116 {offsets = [0, 256], sizes = [8, 128], strides = [1, 1]} : vector<8x384xf32> to vector<8x128xf32>
    %135 = arith.mulf %124, %134 : vector<8x128xf32>
    %136 = arith.addf %133, %135 : vector<8x128xf32>
    %137 = math.tanh %136 : vector<8x128xf32>
    %cst_40 = arith.constant 1.000000e+00 : f32
    %138 = vector.broadcast %cst_40 : f32 to vector<8x128xf32>
    %139 = arith.subf %138, %132 : vector<8x128xf32>
    %140 = arith.mulf %139, %137 : vector<8x128xf32>
    %141 = arith.mulf %132, %109 : vector<8x128xf32>
    %142 = arith.addf %140, %141 : vector<8x128xf32>
    %c4_i32 = arith.constant 4 : i32
    %c8_i32_41 = arith.constant 8 : i32
    %143 = arith.muli %c4_i32, %c8_i32_41 : i32
    %144 = tpu.assume_multiple %143, 8 : i32
    %145 = arith.index_cast %144 : i32 to index
    %c0_42 = arith.constant 0 : index
    %146 = vector.load %arg8[%145, %c0_42] : memref<64x384xf32, #tpu.memory_space<vmem>>, vector<8x384xf32>
    %c0_43 = arith.constant 0 : index
    %c0_44 = arith.constant 0 : index
    %147 = vector.load %arg2[%c0_43, %c0_44] : memref<128x384xf32, #tpu.memory_space<vmem>>, vector<128x384xf32>
    %cst_45 = arith.constant dense<0.000000e+00> : vector<8x384xf32>
    %148 = tpu.matmul %142, %147, %cst_45 {dimension_numbers = #tpu.dot_dimension_numbers<[1], [0], [0], [1], [0, 0, 1, 1], [], []>} : vector<8x128xf32>, vector<128x384xf32>, vector<8x384xf32> -> vector<8x384xf32>
    %149 = arith.addf %148, %9 : vector<8x384xf32>
    %150 = vector.extract_strided_slice %146 {offsets = [0, 0], sizes = [8, 128], strides = [1, 1]} : vector<8x384xf32> to vector<8x128xf32>
    %151 = vector.extract_strided_slice %149 {offsets = [0, 0], sizes = [8, 128], strides = [1, 1]} : vector<8x384xf32> to vector<8x128xf32>
    %152 = arith.addf %150, %151 : vector<8x128xf32>
    %153 = arith.negf %152 : vector<8x128xf32>
    %154 = math.exp %153 : vector<8x128xf32>
    %cst_46 = arith.constant 1.000000e+00 : f32
    %155 = vector.broadcast %cst_46 : f32 to vector<8x128xf32>
    %156 = arith.addf %155, %154 : vector<8x128xf32>
    %157 = arith.divf %155, %156 : vector<8x128xf32>
    %158 = vector.extract_strided_slice %146 {offsets = [0, 128], sizes = [8, 128], strides = [1, 1]} : vector<8x384xf32> to vector<8x128xf32>
    %159 = vector.extract_strided_slice %149 {offsets = [0, 128], sizes = [8, 128], strides = [1, 1]} : vector<8x384xf32> to vector<8x128xf32>
    %160 = arith.addf %158, %159 : vector<8x128xf32>
    %161 = arith.negf %160 : vector<8x128xf32>
    %162 = math.exp %161 : vector<8x128xf32>
    %cst_47 = arith.constant 1.000000e+00 : f32
    %163 = vector.broadcast %cst_47 : f32 to vector<8x128xf32>
    %164 = arith.addf %163, %162 : vector<8x128xf32>
    %165 = arith.divf %163, %164 : vector<8x128xf32>
    %166 = vector.extract_strided_slice %146 {offsets = [0, 256], sizes = [8, 128], strides = [1, 1]} : vector<8x384xf32> to vector<8x128xf32>
    %167 = vector.extract_strided_slice %149 {offsets = [0, 256], sizes = [8, 128], strides = [1, 1]} : vector<8x384xf32> to vector<8x128xf32>
    %168 = arith.mulf %157, %167 : vector<8x128xf32>
    %169 = arith.addf %166, %168 : vector<8x128xf32>
    %170 = math.tanh %169 : vector<8x128xf32>
    %cst_48 = arith.constant 1.000000e+00 : f32
    %171 = vector.broadcast %cst_48 : f32 to vector<8x128xf32>
    %172 = arith.subf %171, %165 : vector<8x128xf32>
    %173 = arith.mulf %172, %170 : vector<8x128xf32>
    %174 = arith.mulf %165, %142 : vector<8x128xf32>
    %175 = arith.addf %173, %174 : vector<8x128xf32>
    %c5_i32 = arith.constant 5 : i32
    %c8_i32_49 = arith.constant 8 : i32
    %176 = arith.muli %c5_i32, %c8_i32_49 : i32
    %177 = tpu.assume_multiple %176, 8 : i32
    %178 = arith.index_cast %177 : i32 to index
    %c0_50 = arith.constant 0 : index
    %179 = vector.load %arg8[%178, %c0_50] : memref<64x384xf32, #tpu.memory_space<vmem>>, vector<8x384xf32>
    %c0_51 = arith.constant 0 : index
    %c0_52 = arith.constant 0 : index
    %180 = vector.load %arg2[%c0_51, %c0_52] : memref<128x384xf32, #tpu.memory_space<vmem>>, vector<128x384xf32>
    %cst_53 = arith.constant dense<0.000000e+00> : vector<8x384xf32>
    %181 = tpu.matmul %175, %180, %cst_53 {dimension_numbers = #tpu.dot_dimension_numbers<[1], [0], [0], [1], [0, 0, 1, 1], [], []>} : vector<8x128xf32>, vector<128x384xf32>, vector<8x384xf32> -> vector<8x384xf32>
    %182 = arith.addf %181, %9 : vector<8x384xf32>
    %183 = vector.extract_strided_slice %179 {offsets = [0, 0], sizes = [8, 128], strides = [1, 1]} : vector<8x384xf32> to vector<8x128xf32>
    %184 = vector.extract_strided_slice %182 {offsets = [0, 0], sizes = [8, 128], strides = [1, 1]} : vector<8x384xf32> to vector<8x128xf32>
    %185 = arith.addf %183, %184 : vector<8x128xf32>
    %186 = arith.negf %185 : vector<8x128xf32>
    %187 = math.exp %186 : vector<8x128xf32>
    %cst_54 = arith.constant 1.000000e+00 : f32
    %188 = vector.broadcast %cst_54 : f32 to vector<8x128xf32>
    %189 = arith.addf %188, %187 : vector<8x128xf32>
    %190 = arith.divf %188, %189 : vector<8x128xf32>
    %191 = vector.extract_strided_slice %179 {offsets = [0, 128], sizes = [8, 128], strides = [1, 1]} : vector<8x384xf32> to vector<8x128xf32>
    %192 = vector.extract_strided_slice %182 {offsets = [0, 128], sizes = [8, 128], strides = [1, 1]} : vector<8x384xf32> to vector<8x128xf32>
    %193 = arith.addf %191, %192 : vector<8x128xf32>
    %194 = arith.negf %193 : vector<8x128xf32>
    %195 = math.exp %194 : vector<8x128xf32>
    %cst_55 = arith.constant 1.000000e+00 : f32
    %196 = vector.broadcast %cst_55 : f32 to vector<8x128xf32>
    %197 = arith.addf %196, %195 : vector<8x128xf32>
    %198 = arith.divf %196, %197 : vector<8x128xf32>
    %199 = vector.extract_strided_slice %179 {offsets = [0, 256], sizes = [8, 128], strides = [1, 1]} : vector<8x384xf32> to vector<8x128xf32>
    %200 = vector.extract_strided_slice %182 {offsets = [0, 256], sizes = [8, 128], strides = [1, 1]} : vector<8x384xf32> to vector<8x128xf32>
    %201 = arith.mulf %190, %200 : vector<8x128xf32>
    %202 = arith.addf %199, %201 : vector<8x128xf32>
    %203 = math.tanh %202 : vector<8x128xf32>
    %cst_56 = arith.constant 1.000000e+00 : f32
    %204 = vector.broadcast %cst_56 : f32 to vector<8x128xf32>
    %205 = arith.subf %204, %198 : vector<8x128xf32>
    %206 = arith.mulf %205, %203 : vector<8x128xf32>
    %207 = arith.mulf %198, %175 : vector<8x128xf32>
    %208 = arith.addf %206, %207 : vector<8x128xf32>
    %c6_i32 = arith.constant 6 : i32
    %c8_i32_57 = arith.constant 8 : i32
    %209 = arith.muli %c6_i32, %c8_i32_57 : i32
    %210 = tpu.assume_multiple %209, 8 : i32
    %211 = arith.index_cast %210 : i32 to index
    %c0_58 = arith.constant 0 : index
    %212 = vector.load %arg8[%211, %c0_58] : memref<64x384xf32, #tpu.memory_space<vmem>>, vector<8x384xf32>
    %c0_59 = arith.constant 0 : index
    %c0_60 = arith.constant 0 : index
    %213 = vector.load %arg2[%c0_59, %c0_60] : memref<128x384xf32, #tpu.memory_space<vmem>>, vector<128x384xf32>
    %cst_61 = arith.constant dense<0.000000e+00> : vector<8x384xf32>
    %214 = tpu.matmul %208, %213, %cst_61 {dimension_numbers = #tpu.dot_dimension_numbers<[1], [0], [0], [1], [0, 0, 1, 1], [], []>} : vector<8x128xf32>, vector<128x384xf32>, vector<8x384xf32> -> vector<8x384xf32>
    %215 = arith.addf %214, %9 : vector<8x384xf32>
    %216 = vector.extract_strided_slice %212 {offsets = [0, 0], sizes = [8, 128], strides = [1, 1]} : vector<8x384xf32> to vector<8x128xf32>
    %217 = vector.extract_strided_slice %215 {offsets = [0, 0], sizes = [8, 128], strides = [1, 1]} : vector<8x384xf32> to vector<8x128xf32>
    %218 = arith.addf %216, %217 : vector<8x128xf32>
    %219 = arith.negf %218 : vector<8x128xf32>
    %220 = math.exp %219 : vector<8x128xf32>
    %cst_62 = arith.constant 1.000000e+00 : f32
    %221 = vector.broadcast %cst_62 : f32 to vector<8x128xf32>
    %222 = arith.addf %221, %220 : vector<8x128xf32>
    %223 = arith.divf %221, %222 : vector<8x128xf32>
    %224 = vector.extract_strided_slice %212 {offsets = [0, 128], sizes = [8, 128], strides = [1, 1]} : vector<8x384xf32> to vector<8x128xf32>
    %225 = vector.extract_strided_slice %215 {offsets = [0, 128], sizes = [8, 128], strides = [1, 1]} : vector<8x384xf32> to vector<8x128xf32>
    %226 = arith.addf %224, %225 : vector<8x128xf32>
    %227 = arith.negf %226 : vector<8x128xf32>
    %228 = math.exp %227 : vector<8x128xf32>
    %cst_63 = arith.constant 1.000000e+00 : f32
    %229 = vector.broadcast %cst_63 : f32 to vector<8x128xf32>
    %230 = arith.addf %229, %228 : vector<8x128xf32>
    %231 = arith.divf %229, %230 : vector<8x128xf32>
    %232 = vector.extract_strided_slice %212 {offsets = [0, 256], sizes = [8, 128], strides = [1, 1]} : vector<8x384xf32> to vector<8x128xf32>
    %233 = vector.extract_strided_slice %215 {offsets = [0, 256], sizes = [8, 128], strides = [1, 1]} : vector<8x384xf32> to vector<8x128xf32>
    %234 = arith.mulf %223, %233 : vector<8x128xf32>
    %235 = arith.addf %232, %234 : vector<8x128xf32>
    %236 = math.tanh %235 : vector<8x128xf32>
    %cst_64 = arith.constant 1.000000e+00 : f32
    %237 = vector.broadcast %cst_64 : f32 to vector<8x128xf32>
    %238 = arith.subf %237, %231 : vector<8x128xf32>
    %239 = arith.mulf %238, %236 : vector<8x128xf32>
    %240 = arith.mulf %231, %208 : vector<8x128xf32>
    %241 = arith.addf %239, %240 : vector<8x128xf32>
    %c7_i32 = arith.constant 7 : i32
    %c8_i32_65 = arith.constant 8 : i32
    %242 = arith.muli %c7_i32, %c8_i32_65 : i32
    %243 = tpu.assume_multiple %242, 8 : i32
    %244 = arith.index_cast %243 : i32 to index
    %c0_66 = arith.constant 0 : index
    %245 = vector.load %arg8[%244, %c0_66] : memref<64x384xf32, #tpu.memory_space<vmem>>, vector<8x384xf32>
    %c0_67 = arith.constant 0 : index
    %c0_68 = arith.constant 0 : index
    %246 = vector.load %arg2[%c0_67, %c0_68] : memref<128x384xf32, #tpu.memory_space<vmem>>, vector<128x384xf32>
    %cst_69 = arith.constant dense<0.000000e+00> : vector<8x384xf32>
    %247 = tpu.matmul %241, %246, %cst_69 {dimension_numbers = #tpu.dot_dimension_numbers<[1], [0], [0], [1], [0, 0, 1, 1], [], []>} : vector<8x128xf32>, vector<128x384xf32>, vector<8x384xf32> -> vector<8x384xf32>
    %248 = arith.addf %247, %9 : vector<8x384xf32>
    %249 = vector.extract_strided_slice %245 {offsets = [0, 0], sizes = [8, 128], strides = [1, 1]} : vector<8x384xf32> to vector<8x128xf32>
    %250 = vector.extract_strided_slice %248 {offsets = [0, 0], sizes = [8, 128], strides = [1, 1]} : vector<8x384xf32> to vector<8x128xf32>
    %251 = arith.addf %249, %250 : vector<8x128xf32>
    %252 = arith.negf %251 : vector<8x128xf32>
    %253 = math.exp %252 : vector<8x128xf32>
    %cst_70 = arith.constant 1.000000e+00 : f32
    %254 = vector.broadcast %cst_70 : f32 to vector<8x128xf32>
    %255 = arith.addf %254, %253 : vector<8x128xf32>
    %256 = arith.divf %254, %255 : vector<8x128xf32>
    %257 = vector.extract_strided_slice %245 {offsets = [0, 128], sizes = [8, 128], strides = [1, 1]} : vector<8x384xf32> to vector<8x128xf32>
    %258 = vector.extract_strided_slice %248 {offsets = [0, 128], sizes = [8, 128], strides = [1, 1]} : vector<8x384xf32> to vector<8x128xf32>
    %259 = arith.addf %257, %258 : vector<8x128xf32>
    %260 = arith.negf %259 : vector<8x128xf32>
    %261 = math.exp %260 : vector<8x128xf32>
    %cst_71 = arith.constant 1.000000e+00 : f32
    %262 = vector.broadcast %cst_71 : f32 to vector<8x128xf32>
    %263 = arith.addf %262, %261 : vector<8x128xf32>
    %264 = arith.divf %262, %263 : vector<8x128xf32>
    %265 = vector.extract_strided_slice %245 {offsets = [0, 256], sizes = [8, 128], strides = [1, 1]} : vector<8x384xf32> to vector<8x128xf32>
    %266 = vector.extract_strided_slice %248 {offsets = [0, 256], sizes = [8, 128], strides = [1, 1]} : vector<8x384xf32> to vector<8x128xf32>
    %267 = arith.mulf %256, %266 : vector<8x128xf32>
    %268 = arith.addf %265, %267 : vector<8x128xf32>
    %269 = math.tanh %268 : vector<8x128xf32>
    %cst_72 = arith.constant 1.000000e+00 : f32
    %270 = vector.broadcast %cst_72 : f32 to vector<8x128xf32>
    %271 = arith.subf %270, %264 : vector<8x128xf32>
    %272 = arith.mulf %271, %269 : vector<8x128xf32>
    %273 = arith.mulf %264, %241 : vector<8x128xf32>
    %274 = arith.addf %272, %273 : vector<8x128xf32>
    %c8_i32_73 = arith.constant 8 : i32
    %c0_74 = arith.constant 0 : index
    %c0_75 = arith.constant 0 : index
    %275 = vector.load %arg5[%c0_74, %c0_75] : memref<128x128xf32, #tpu.memory_space<vmem>>, vector<128x128xf32>
    %cst_76 = arith.constant dense<0.000000e+00> : vector<8x128xf32>
    %276 = tpu.matmul %274, %275, %cst_76 {dimension_numbers = #tpu.dot_dimension_numbers<[1], [0], [0], [1], [0, 0, 1, 1], [], []>} : vector<8x128xf32>, vector<128x128xf32>, vector<8x128xf32> -> vector<8x128xf32>
    %c0_77 = arith.constant 0 : index
    %c0_78 = arith.constant 0 : index
    %277 = vector.load %arg6[%c0_77, %c0_78] : memref<1x128xf32, #tpu.memory_space<vmem>>, vector<1x128xf32>
    %278 = vector.broadcast %277 : vector<1x128xf32> to vector<8x128xf32>
    %279 = arith.addf %276, %278 : vector<8x128xf32>
    %280 = math.exp %279 : vector<8x128xf32>
    %c0_79 = arith.constant 0 : index
    %c0_80 = arith.constant 0 : index
    %281 = vector.load %arg7[%c0_79, %c0_80] : memref<8x128xf32, #tpu.memory_space<vmem>>, vector<8x128xf32>
    tpu.vector_store %arg7[%c0_79, %c0_80], %280 {strides = array<i32>} : memref<8x128xf32, #tpu.memory_space<vmem>>, vector<8x128xf32>,
    return
  }
}

</mosaic_0001>

<bundles_post_ra>
// kernel: gru_model_n_forward.1
= control target key start
LH: loop header
LB: loop body
LE: loop exit
PB: predicated region body
PF: predicated region fallthrough
CT: control target
= control target key end

     0   :  { %v3079_v3 = vmov 0.0   ;;  %vm3081_vm0 = vmmov 0   ;;  %s3902_s1 = inlined_call_operand.vmem [shape: f32[128,384], index: 1, kind: input, shape index: {}]   ;;  %s3903_s0 = inlined_call_operand.vmem [shape: f32[64,128], index: 0, kind: input, shape index: {}]   ;;  %s3904_s2 = inlined_call_operand.vmem [shape: f32[128,384], index: 2, kind: input, shape index: {}]   ;;  %s3905_s3 = inlined_call_operand.vmem [shape: f32[1,384], index: 3, kind: input, shape index: {}]   ;;  %s3906_s4 = inlined_call_operand.vmem [shape: f32[1,384], index: 4, kind: input, shape index: {}]   ;;  %s3907_s5 = inlined_call_operand.vmem [shape: f32[128,128], index: 5, kind: input, shape index: {}]   ;;  %s3908_s6 = inlined_call_operand.vmem [shape: f32[1,128], index: 6, kind: input, shape index: {}]   ;;  %s3909_s7 = inlined_call_operand.vmem [shape: f32[8,128], index: 7, kind: output, shape index: {}]  }
   0x1   :  { %v35_v0 = vld [vmem:[%s3902_s1 + $0x8] sm:$0xff]  ;;  %v38_v1 = vld [vmem:[%s3902_s1 + $0x20] sm:$0xff]  ;;  %163 = vmatprep.mubr.f32.mxu0 %v3079_v3  ;;  %v37_v5 = vld [vmem:[%s3902_s1 + $0x18] sm:$0xff] }
   0x2   :  { %v34_v2 = vld [vmem:[%s3902_s1] sm:$0xff]  ;;  %v2410_v4 = vpack.c.bf16 %v38_v1, %v35_v0  ;;  %v41_v6 = vld [vmem:[%s3902_s1 + $0x38] sm:$0xff]  ;;  %v44_v7 = vld [vmem:[%s3902_s1 + $0x50] sm:$0xff] }
   0x3   :  { %v2412_v8 = vpack.c.bf16 %v37_v5, %v34_v2  ;;  %v2414_v9 = vpack.c.bf16 %v44_v7, %v41_v6  ;;  %v40_v10 = vld [vmem:[%s3902_s1 + $0x30] sm:$0xff]  ;;  %v43_v11 = vld [vmem:[%s3902_s1 + $0x48] sm:$0xff]  ;;  %v50_v13 = vld [vmem:[%s3902_s1 + $0x80] sm:$0xff] }
   0x4   :  { %v47_v12 = vld [vmem:[%s3902_s1 + $0x68] sm:$0xff]  ;;  %2411 = vmatprep.subr.bf16.mxu0 %v2410_v4  ;;  %v2416_v14 = vpack.c.bf16 %v43_v11, %v40_v10  ;;  %v46_v16 = vld [vmem:[%s3902_s1 + $0x60] sm:$0xff]  ;;  %v49_v17 = vld [vmem:[%s3902_s1 + $0x78] sm:$0xff] }
   0x5   :  { %2413 = vmatpush1.bf16.msra.mxu0 %v2412_v8  ;;  %v2418_v15 = vpack.c.bf16 %v50_v13, %v47_v12  ;;  %v53_v18 = vld [vmem:[%s3902_s1 + $0x98] sm:$0xff]  ;;  %v56_v19 = vld [vmem:[%s3902_s1 + $0xb0] sm:$0xff]  ;;  %v2420_v20 = vpack.c.bf16 %v49_v17, %v46_v16  ;;  %v55_v23 = vld [vmem:[%s3902_s1 + $0xa8] sm:$0xff] }
   0x6   :  { %2415 = vmatprep.subr.bf16.mxu0 %v2414_v9  ;;  %v52_v21 = vld [vmem:[%s3902_s1 + $0x90] sm:$0xff]  ;;  %v2422_v22 = vpack.c.bf16 %v56_v19, %v53_v18  ;;  %v39_v25 = vld [vmem:[%s3902_s1 + $0x28] sm:$0xff]  ;;  %v62_v27 = vld [vmem:[%s3902_s1 + $0xe0] sm:$0xff] }
   0x7   :  { %v36_v24 = vld [vmem:[%s3902_s1 + $0x10] sm:$0xff]  ;;  %v59_v26 = vld [vmem:[%s3902_s1 + $0xc8] sm:$0xff]  ;;  %v42_v29 = vld [vmem:[%s3902_s1 + $0x40] sm:$0xff]  ;;  %v2424_v31 = vpack.c.bf16 %v55_v23, %v52_v21 }
   0x8   :  { %v2442_v28 = vpack.c.bf16 %v39_v25, %v36_v24  ;;  %v45_v30 = vld [vmem:[%s3902_s1 + $0x58] sm:$0xff]  ;;  %v58_v32 = vld [vmem:[%s3902_s1 + $0xc0] sm:$0xff]  ;;  %v2426_v34 = vpack.c.bf16 %v62_v27, %v59_v26  ;;  %v48_v37 = vld [vmem:[%s3902_s1 + $0x70] sm:$0xff] }
   0x9   :  { %2417 = vmatpush1.bf16.msra.mxu0 %v2416_v14  ;;  %v2446_v33 = vpack.c.bf16 %v45_v30, %v42_v29  ;;  %v61_v35 = vld [vmem:[%s3902_s1 + $0xd8] sm:$0xff]  ;;  %v3198_v36 = vld [vmem:[%s3903_s0] sm:$0xff]  ;;  %v68_v39 = vld [vmem:[%s3902_s1 + $0x110] sm:$0xff] }
   0xa   :  { %2419 = vmatprep.subr.bf16.mxu0 %v2418_v15  ;;  %2443 = vmatprep.subr.bf16.mxu1 %v2442_v28  ;;  %v65_v38 = vld [vmem:[%s3902_s1 + $0xf8] sm:$0xff]  ;;  %v51_v40 = vld [vmem:[%s3902_s1 + $0x88] sm:$0xff]  ;;  %v2428_v42 = vpack.c.bf16 %v61_v35, %v58_v32  ;;  %v54_v43 = vld [vmem:[%s3902_s1 + $0xa0] sm:$0xff] }
   0xb   :  { %2445 = vmatpush3.bf16.msra.mxu1 %v2442_v28  ;;  %2083 = vmatprep.mubr.f32.mxu1 %v3198_v36  ;;  %v2450_v41 = vpack.c.bf16 %v51_v40, %v48_v37  ;;  %v57_v44 = vld [vmem:[%s3902_s1 + $0xb8] sm:$0xff]  ;;  %v2430_v45 = vpack.c.bf16 %v68_v39, %v65_v38  ;;  %v64_v46 = vld [vmem:[%s3902_s1 + $0xf0] sm:$0xff]  ;;  %v67_v47 = vld [vmem:[%s3902_s1 + $0x108] sm:$0xff]  ;;  %v3080_v40 = vmov 0.0|0.0  }
   0xc   :  { %2447 = vmatprep.subr.bf16.mxu1 %v2446_v33  ;;  %v71_v48 = vld [vmem:[%s3902_s1 + $0x128] sm:$0xff]  ;;  %v74_v49 = vld [vmem:[%s3902_s1 + $0x140] sm:$0xff]  ;;  %v2454_v50 = vpack.c.bf16 %v57_v44, %v54_v43  ;;  %v60_v51 = vld [vmem:[%s3902_s1 + $0xd0] sm:$0xff]  ;;  %v2432_v53 = vpack.c.bf16 %v67_v47, %v64_v46 }
   0xd   :  { %2421 = vmatpush1.bf16.msra.mxu0 %v2420_v20  ;;  %v63_v52 = vld [vmem:[%s3902_s1 + $0xe8] sm:$0xff]  ;;  %v2434_v54 = vpack.c.bf16 %v74_v49, %v71_v48  ;;  %v70_v55 = vld [vmem:[%s3902_s1 + $0x120] sm:$0xff]  ;;  %v73_v56 = vld [vmem:[%s3902_s1 + $0x138] sm:$0xff] }
   0xe   :  { %2423 = vmatprep.subr.bf16.mxu0 %v2422_v22  ;;  %v77_v57 = vld [vmem:[%s3902_s1 + $0x158] sm:$0xff]  ;;  %v80_v58 = vld [vmem:[%s3902_s1 + $0x170] sm:$0xff]  ;;  %v2458_v59 = vpack.c.bf16 %v63_v52, %v60_v51  ;;  %v66_v60 = vld [vmem:[%s3902_s1 + $0x100] sm:$0xff]  ;;  %v2436_v62 = vpack.c.bf16 %v73_v56, %v70_v55 }
   0xf   :  { %2449 = vmatpush3.bf16.msra.mxu1 %v2446_v33  ;;  %v69_v61 = vld [vmem:[%s3902_s1 + $0x118] sm:$0xff]  ;;  %v2438_v63 = vpack.c.bf16 %v80_v58, %v77_v57  ;;  %v76_v0 = vld [vmem:[%s3902_s1 + $0x150] sm:$0xff]  ;;  %v79_v1 = vld [vmem:[%s3902_s1 + $0x168] sm:$0xff] }
  0x10   :  { %2451 = vmatprep.subr.bf16.mxu1 %v2450_v41  ;;  %v365_v2 = vld [vmem:[%s3904_s2 + $0x8] sm:$0xff]  ;;  %v368_v4 = vld [vmem:[%s3904_s2 + $0x20] sm:$0xff]  ;;  %v2462_v5 = vpack.c.bf16 %v69_v61, %v66_v60  ;;  %v72_v6 = vld [vmem:[%s3902_s1 + $0x130] sm:$0xff]  ;;  %v2440_v8 = vpack.c.bf16 %v79_v1, %v76_v0 }
  0x11   :  { %2425 = vmatpush1.bf16.msra.mxu0 %v2424_v31  ;;  %v75_v7 = vld [vmem:[%s3902_s1 + $0x148] sm:$0xff]  ;;  %v3273_v9 = vpack.c.bf16 %v368_v4, %v365_v2  ;;  %v364_v10 = vld [vmem:[%s3904_s2] sm:$0xff]  ;;  %v367_v11 = vld [vmem:[%s3904_s2 + $0x18] sm:$0xff] }
  0x12   :  { %2427 = vmatprep.subr.bf16.mxu0 %v2426_v34  ;;  %v371_v12 = vld [vmem:[%s3904_s2 + $0x38] sm:$0xff]  ;;  %v374_v13 = vld [vmem:[%s3904_s2 + $0x50] sm:$0xff]  ;;  %v2466_v14 = vpack.c.bf16 %v75_v7, %v72_v6  ;;  %v78_v15 = vld [vmem:[%s3902_s1 + $0x160] sm:$0xff]  ;;  %v3293_v17 = vpack.c.bf16 %v367_v11, %v364_v10 }
  0x13   :  { %2453 = vmatpush3.bf16.msra.mxu1 %v2450_v41  ;;  %v81_v16 = vld [vmem:[%s3902_s1 + $0x178] sm:$0xff]  ;;  %v3296_v18 = vpack.c.bf16 %v374_v13, %v371_v12  ;;  %v370_v19 = vld [vmem:[%s3904_s2 + $0x30] sm:$0xff]  ;;  %v373_v20 = vld [vmem:[%s3904_s2 + $0x48] sm:$0xff] }
  0x14   :  { %2455 = vmatprep.subr.bf16.mxu1 %v2454_v50  ;;  %v377_v21 = vld [vmem:[%s3904_s2 + $0x68] sm:$0xff]  ;;  %v380_v22 = vld [vmem:[%s3904_s2 + $0x80] sm:$0xff]  ;;  %v2470_v23 = vpack.c.bf16 %v81_v16, %v78_v15  ;;  %v3316_v25 = vpack.c.bf16 %v373_v20, %v370_v19  ;;  %v379_v28 = vld [vmem:[%s3904_s2 + $0x78] sm:$0xff] }
  0x15   :  { %2429 = vmatpush1.bf16.msra.mxu0 %v2428_v42  ;;  %v27_v24 = vld [vmem:[%s3903_s0 + $0x8] sm:$0xff]  ;;  %v3319_v26 = vpack.c.bf16 %v380_v22, %v377_v21  ;;  %v376_v27 = vld [vmem:[%s3904_s2 + $0x60] sm:$0xff]  ;;  %v383_v29 = vld [vmem:[%s3904_s2 + $0x98] sm:$0xff] }
  0x16   :  { %2431 = vmatprep.subr.bf16.mxu0 %v2430_v45  ;;  %v386_v30 = vld [vmem:[%s3904_s2 + $0xb0] sm:$0xff]  ;;  %v369_v32 = vld [vmem:[%s3904_s2 + $0x28] sm:$0xff]  ;;  %v3344_v34 = vpack.c.bf16 %v379_v28, %v376_v27  ;;  %v392_v39 = vld [vmem:[%s3904_s2 + $0xe0] sm:$0xff] }
  0x17   :  { %2457 = vmatpush3.bf16.msra.mxu1 %v2454_v50  ;;  %v366_v31 = vld [vmem:[%s3904_s2 + $0x10] sm:$0xff]  ;;  %v3347_v35 = vpack.c.bf16 %v386_v30, %v383_v29  ;;  %v385_v37 = vld [vmem:[%s3904_s2 + $0xa8] sm:$0xff]  ;;  %v372_v42 = vld [vmem:[%s3904_s2 + $0x40] sm:$0xff] }
  0x18   :  { %2459 = vmatprep.subr.bf16.mxu1 %v2458_v59  ;;  %v28_v33 = vld [vmem:[%s3903_s0 + $0x10] sm:$0xff]  ;;  %v389_v38 = vld [vmem:[%s3904_s2 + $0xc8] sm:$0xff]  ;;  %v3362_v41 = vpack.c.bf16 %v369_v32, %v366_v31  ;;  %v375_v43 = vld [vmem:[%s3904_s2 + $0x58] sm:$0xff] }
  0x19   :  { %2433 = vmatpush1.bf16.msra.mxu0 %v2432_v53  ;;  %v29_v44 = vld [vmem:[%s3903_s0 + $0x18] sm:$0xff]  ;;  %v3378_v46 = vpack.c.bf16 %v392_v39, %v389_v38  ;;  %v388_v47 = vld [vmem:[%s3904_s2 + $0xc0] sm:$0xff]  ;;  %v398_v50 = vld [vmem:[%s3904_s2 + $0x110] sm:$0xff]  ;;  %v3393_v51 = vpack.c.bf16 %v375_v43, %v372_v42 }
  0x1a   :  { %2435 = vmatprep.subr.bf16.mxu0 %v2434_v54  ;;  %v391_v48 = vld [vmem:[%s3904_s2 + $0xd8] sm:$0xff]  ;;  %v378_v52 = vld [vmem:[%s3904_s2 + $0x70] sm:$0xff]  ;;  %v381_v53 = vld [vmem:[%s3904_s2 + $0x88] sm:$0xff] }
  0x1b   :  { %2461 = vmatpush3.bf16.msra.mxu1 %v2458_v59  ;;  %v395_v49 = vld [vmem:[%s3904_s2 + $0xf8] sm:$0xff]  ;;  %v30_v54 = vld [vmem:[%s3903_s0 + $0x20] sm:$0xff]  ;;  %v3407_v55 = vpack.c.bf16 %v391_v48, %v388_v47  ;;  %v394_v57 = vld [vmem:[%s3904_s2 + $0xf0] sm:$0xff]  ;;  %v3425_v61 = vpack.c.bf16 %v381_v53, %v378_v52 }
  0x1c   :  { %2463 = vmatprep.subr.bf16.mxu1 %v2462_v5  ;;  %v3410_v56 = vpack.c.bf16 %v398_v50, %v395_v49  ;;  %v397_v58 = vld [vmem:[%s3904_s2 + $0x108] sm:$0xff]  ;;  %v404_v60 = vld [vmem:[%s3904_s2 + $0x140] sm:$0xff]  ;;  %v32_v2 = vld [vmem:[%s3903_s0 + $0x30] sm:$0xff] }
  0x1d   :  { %2437 = vmatpush1.bf16.msra.mxu0 %v2436_v62  ;;  %v401_v59 = vld [vmem:[%s3904_s2 + $0x128] sm:$0xff]  ;;  %v384_v62 = vld [vmem:[%s3904_s2 + $0xa0] sm:$0xff]  ;;  %v3439_v1 = vpack.c.bf16 %v397_v58, %v394_v57  ;;  %v403_v6 = vld [vmem:[%s3904_s2 + $0x138] sm:$0xff] }
  0x1e   :  { %2439 = vmatprep.subr.bf16.mxu0 %v2438_v63  ;;  %v387_v63 = vld [vmem:[%s3904_s2 + $0xb8] sm:$0xff]  ;;  %v31_v0 = vld [vmem:[%s3903_s0 + $0x28] sm:$0xff]  ;;  %v3445_v4 = vpack.c.bf16 %v404_v60, %v401_v59  ;;  %v390_v11 = vld [vmem:[%s3904_s2 + $0xd0] sm:$0xff] }
  0x1f   :  { %2465 = vmatpush3.bf16.msra.mxu1 %v2462_v5  ;;  %v400_v5 = vld [vmem:[%s3904_s2 + $0x120] sm:$0xff]  ;;  %v407_v7 = vld [vmem:[%s3904_s2 + $0x158] sm:$0xff]  ;;  %v3460_v10 = vpack.c.bf16 %v387_v63, %v384_v62  ;;  %v393_v12 = vld [vmem:[%s3904_s2 + $0xe8] sm:$0xff] }
  0x20   :  { %2467 = vmatprep.subr.bf16.mxu1 %v2466_v14  ;;  %v3471_v13 = vpack.c.bf16 %v403_v6, %v400_v5  ;;  %v406_v16 = vld [vmem:[%s3904_s2 + $0x150] sm:$0xff]  ;;  %v409_v19 = vld [vmem:[%s3904_s2 + $0x168] sm:$0xff]  ;;  %v3486_v20 = vpack.c.bf16 %v393_v12, %v390_v11  ;;  %v396_v21 = vld [vmem:[%s3904_s2 + $0x100] sm:$0xff] }
  0x21   :  { %2441 = vmatpush1.bf16.msra.mxu0 %v2440_v8  ;;  %v410_v8 = vld [vmem:[%s3904_s2 + $0x170] sm:$0xff]  ;;  %v399_v22 = vld [vmem:[%s3904_s2 + $0x118] sm:$0xff]  ;;  %v405_v28 = vld [vmem:[%s3904_s2 + $0x148] sm:$0xff] }
  0x22   :  { %2475 = vmatprep.subr.bf16.mxu0 %v3273_v9  ;;  %v3477_v15 = vpack.c.bf16 %v410_v8, %v407_v7  ;;  %v402_v27 = vld [vmem:[%s3904_s2 + $0x130] sm:$0xff]  ;;  %v408_v30 = vld [vmem:[%s3904_s2 + $0x160] sm:$0xff]  ;;  %v411_v31 = vld [vmem:[%s3904_s2 + $0x178] sm:$0xff] }
  0x23   :  { %2469 = vmatpush3.bf16.msra.mxu1 %v2466_v14  ;;  %v33_v14 = vld [vmem:[%s3903_s0 + $0x38] sm:$0xff]  ;;  %v3516_v29 = vpack.c.bf16 %v405_v28, %v402_v27  ;;  %v3530_v32 = vpack.c.bf16 %v411_v31, %v408_v30  ;;  %v82_v38 = vld [vmem:[%s3905_s3] sm:$0x7] }
  0x24   :  { %164 = vmatmul.mubr.f32.vlgmr.msra.gmra.mrb[0].mxu0 %v3198_v36  ;;  %2471 = vmatprep.subr.bf16.mxu1 %v2470_v23  ;;  %v382_v36 = vld [vmem:[%s3904_s2 + $0x90] sm:$0xff]  ;;  %v341_v59 = vld [vmem:[%s3906_s4] sm:$0x7] }
  0x25   :  { %2477 = vmatpush1.bf16.msra.mxu0 %v3293_v17  ;;  %169 = vmatprep.mubr.f32.mxu0 %v3079_v3  ;;  %v3375_v45 = vpack.c.bf16 %v385_v37, %v382_v36 }
  0x26   :  { %2479 = vmatprep.subr.bf16.mxu0 %v3296_v18 }
  0x27   :  { %2473 = vmatpush3.bf16.msra.mxu1 %v2470_v23  ;;  %v3499_v23 = vpack.c.bf16 %v409_v19, %v406_v16 }
  0x28   :  { %170 = vmatmul.mubr.f32.gmra.mrb[2].mxu0 %v27_v24  ;;  %2506 = vmatprep.subr.bf16.mxu1 %v3080_v40 }
  0x29   :  { %2481 = vmatpush1.bf16.msra.mxu0 %v3316_v25  ;;  %175 = vmatprep.mubr.f32.mxu0 %v3079_v3 }
  0x2a   :  { %2483 = vmatprep.subr.bf16.mxu0 %v3319_v26  ;;  %2084 = vmatmul.mubr.f32.vlgmr.msra.gmra.mrb[0].mxu1 %v27_v24  ;;  %v3503_v24 = vpack.c.bf16 %v399_v22, %v396_v21 }
  0x2b   :  { %2508 = vmatpush3.bf16.msra.mxu1 %v3362_v41  ;;  %2086 = vmatprep.mubr.f32.mxu1 %v28_v33 }
  0x2c   :  { %176 = vmatmul.mubr.f32.gmra.mrb[4].mxu0 %v28_v33  ;;  %2509 = vmatprep.subr.bf16.mxu1 %v3080_v40  ;;  %v84_v33 = vlaneseq }
  0x2d   :  { %2485 = vmatpush1.bf16.msra.mxu0 %v3344_v34  ;;  %181 = vmatprep.mubr.f32.mxu0 %v3079_v3 }
  0x2e   :  { %2487 = vmatprep.subr.bf16.mxu0 %v3347_v35  ;;  %2087 = vmatmul.mubr.f32.gmra.mrb[2].mxu1 %v29_v44  ;;  %v85_v36 = vshrl.u32 %v84_v33, 7 }
  0x2f   :  { %2511 = vmatpush3.bf16.msra.mxu1 %v3393_v51  ;;  %2089 = vmatprep.mubr.f32.mxu1 %v30_v54 }
  0x30   :  { %182 = vmatmul.mubr.f32.gmra.mrb[6].mxu0 %v29_v44  ;;  %2512 = vmatprep.subr.bf16.mxu1 %v3080_v40  ;;  %v94_v37 = vsub.s32 2, %v85_v36  ;;  %v86_v58 = vsub.s32 0, %v85_v36 }
  0x31   :  { %2489 = vmatpush1.bf16.msra.mxu0 %v3375_v45  ;;  %187 = vmatprep.mubr.f32.mxu0 %v3079_v3 }
  0x32   :  { %2491 = vmatprep.subr.bf16.mxu0 %v3378_v46  ;;  %2090 = vmatmul.mubr.f32.gmra.mrb[4].mxu1 %v31_v0  ;;  %v95_v39 = vrot.slane %v82_v38, %v94_v37  ;;  %v87_v5 = vrot.slane %v82_v38, %v86_v58  ;;  %v346_v6 = vrot.slane %v341_v59, %v86_v58 }
  0x33   :  { %2514 = vmatpush3.bf16.msra.mxu1 %v3425_v61  ;;  %2092 = vmatprep.mubr.f32.mxu1 %v32_v2 }
  0x34   :  { %188 = vmatmul.mubr.f32.gmra.mrb[8].mxu0 %v30_v54  ;;  %2515 = vmatprep.subr.bf16.mxu1 %v3080_v40  ;;  %v3588_v11 = vadd.f32 %v346_v6, %v87_v5 }
  0x35   :  { %2493 = vmatpush1.bf16.msra.mxu0 %v3407_v55  ;;  %193 = vmatprep.mubr.f32.mxu0 %v3079_v3 }
  0x36   :  { %2495 = vmatprep.subr.bf16.mxu0 %v3410_v56  ;;  %2093 = vmatmul.mubr.f32.gmra.mrb[6].mxu1 %v33_v14 }
  0x37   :  { %2517 = vmatpush3.bf16.msra.mxu1 %v3460_v10  ;;  %2127 = vmatprep.mubr.msk.f32.mxu1 %vm3081_vm0, %v3079_v3 }
  0x38   :  { %194 = vmatmul.mubr.f32.gmra.mrb[10].mxu0 %v31_v0  ;;  %2518 = vmatprep.subr.bf16.mxu1 %v3080_v40  ;;  %v90_v0 = vsub.s32 1, %v85_v36  ;;  %v3594_v36 = vrot.slane %v341_v59, %v94_v37 }
  0x39   :  { %2497 = vmatpush1.bf16.msra.mxu0 %v3439_v1  ;;  %199 = vmatprep.mubr.f32.mxu0 %v3079_v3 }
  0x3a   :  { %2499 = vmatprep.subr.bf16.mxu0 %v3445_v4  ;;  %v91_v7 = vrot.slane %v82_v38, %v90_v0  ;;  %v350_v8 = vrot.slane %v341_v59, %v90_v0 }
  0x3b   :  { %2520 = vmatpush3.bf16.msra.mxu1 %v3486_v20 }
  0x3c   :  { %200 = vmatmul.mubr.f32.gmra.mrb[12].mxu0 %v32_v2  ;;  %2521 = vmatprep.subr.bf16.mxu1 %v3080_v40 }
  0x3d   :  { %2501 = vmatpush1.bf16.msra.mxu0 %v3471_v13  ;;  %205 = vmatprep.mubr.f32.mxu0 %v3079_v3 }
  0x3e   :  { %2503 = vmatprep.subr.bf16.mxu0 %v3477_v15 }
  0x3f   :  { %2523 = vmatpush3.bf16.msra.mxu1 %v3503_v24 }
  0x40   :  { %206 = vmatmul.mubr.f32.gmra.mrb[14].mxu0 %v33_v14  ;;  %2524 = vmatprep.subr.bf16.mxu1 %v3080_v40  ;;  %v3590_v14 = vadd.f32 %v350_v8, %v91_v7 }
  0x41   :  { %2505 = vmatpush1.bf16.msra.mxu0 %v3499_v23  ;;  %476 = vmatprep.mubr.f32.mxu0 %v3079_v3 }
  0x42   :  { %2531 = vmatprep.subr.bf16.mxu0 %v3273_v9 }
  0x43   :  { %2526 = vmatpush3.bf16.msra.mxu1 %v3516_v29 }
  0x44   :  { %477 = vmatmul.mubr.f32.vlgmr.msra.gmra.mrb[0].mxu0 %v3079_v3  ;;  %2527 = vmatprep.subr.bf16.mxu1 %v3080_v40 }
  0x45   :  { %2533 = vmatpush1.bf16.msra.mxu0 %v3293_v17  ;;  %644 = vmatprep.mubr.f32.mxu0 %v3079_v3 }
  0x46   :  { %2535 = vmatprep.subr.bf16.mxu0 %v3296_v18 }
  0x47   :  { %2529 = vmatpush3.bf16.msra.mxu1 %v3530_v32 }
  0x48   :  { %2562 = vmatprep.subr.bf16.mxu1 %v3080_v40 }
  0x49   :  { %2537 = vmatpush1.bf16.msra.mxu0 %v3316_v25 }
  0x4a   :  { %2539 = vmatprep.subr.bf16.mxu0 %v3319_v26  ;;  %2128 = vmatmul.mubr.f32.vlgmr.msra.gmra.mrb[8].mxu1 %v3079_v3 }
  0x4b   :  { %2564 = vmatpush3.bf16.msra.mxu1 %v3362_v41  ;;  %2162 = vmatprep.mubr.msk.f32.mxu1 %vm3081_vm0, %v3079_v3 }
  0x4c   :  { %2565 = vmatprep.subr.bf16.mxu1 %v3080_v40 }
  0x4d   :  { %2541 = vmatpush1.bf16.msra.mxu0 %v3344_v34 }
  0x4e   :  { %2543 = vmatprep.subr.bf16.mxu0 %v3347_v35 }
  0x4f   :  { %2567 = vmatpush3.bf16.msra.mxu1 %v3393_v51 }
  0x50   :  { %2568 = vmatprep.subr.bf16.mxu1 %v3080_v40 }
  0x51   :  { %2545 = vmatpush1.bf16.msra.mxu0 %v3375_v45 }
  0x52   :  { %2547 = vmatprep.subr.bf16.mxu0 %v3378_v46 }
  0x53   :  { %2570 = vmatpush3.bf16.msra.mxu1 %v3425_v61 }
  0x54   :  { %2571 = vmatprep.subr.bf16.mxu1 %v3080_v40 }
  0x55   :  { %2549 = vmatpush1.bf16.msra.mxu0 %v3407_v55 }
  0x56   :  { %2551 = vmatprep.subr.bf16.mxu0 %v3410_v56 }
  0x57   :  { %2573 = vmatpush3.bf16.msra.mxu1 %v3460_v10 }
  0x58   :  { %2574 = vmatprep.subr.bf16.mxu1 %v3080_v40 }
  0x59   :  { %2553 = vmatpush1.bf16.msra.mxu0 %v3439_v1 }
  0x5a   :  { %2555 = vmatprep.subr.bf16.mxu0 %v3445_v4 }
  0x5b   :  { %2576 = vmatpush3.bf16.msra.mxu1 %v3486_v20 }
  0x5c   :  { %2577 = vmatprep.subr.bf16.mxu1 %v3080_v40 }
  0x5d   :  { %2557 = vmatpush1.bf16.msra.mxu0 %v3471_v13 }
  0x5e   :  { %2559 = vmatprep.subr.bf16.mxu0 %v3477_v15 }
  0x5f   :  { %2579 = vmatpush3.bf16.msra.mxu1 %v3503_v24 }
  0x60   :  { %2580 = vmatprep.subr.bf16.mxu1 %v3080_v40 }
  0x61   :  { %2561 = vmatpush1.bf16.msra.mxu0 %v3499_v23 }
  0x62   :  { %2587 = vmatprep.subr.bf16.mxu0 %v3273_v9 }
  0x63   :  { %2582 = vmatpush3.bf16.msra.mxu1 %v3516_v29 }
  0x64   :  { %2583 = vmatprep.subr.bf16.mxu1 %v3080_v40 }
  0x67   :  { %2585 = vmatpush3.bf16.msra.mxu1 %v3530_v32 }
  0x68   :  { %2618 = vmatprep.subr.bf16.mxu1 %v3080_v40 }
  0xfd   :  { %v2085_v42 = vpop.f32.mrb[0].mxu1 }
  0xfe   :  { %v3571_v43 = vadd.f32 %v2085_v42, %v95_v39  ;;  %v278_v44 = vpop.f32.mrb[1].mxu1 }
 0x101   :  { %v2088_v47 = vpop.f32.mrb[2].mxu1 }
 0x102   :  { %v3573_v48 = vadd.f32 %v2088_v47, %v95_v39  ;;  %v288_v49 = vpop.f32.mrb[3].mxu1 }
 0x103   :  { %v3575_v50 = vadd.f32 %v288_v49, %v95_v39 }
 0x105   :  { %v2091_v52 = vpop.f32.mrb[4].mxu1 }
 0x106   :  { %v3577_v53 = vadd.f32 %v2091_v52, %v95_v39  ;;  %v298_v54 = vpop.f32.mrb[5].mxu1  ;;  %v279_v52 = vadd.f32 %v278_v44, %v95_v39 }
 0x107   :  { %v3579_v57 = vadd.f32 %v298_v54, %v95_v39 }
 0x109   :  { %v2094_v60 = vpop.f32.mrb[6].mxu1 }
 0x10a   :  { %v3584_v62 = vadd.f32 %v2094_v60, %v95_v39  ;;  %v308_v63 = vpop.f32.mrb[7].mxu1 }
 0x10b   :  { %v3586_v2 = vadd.f32 %v308_v63, %v95_v39 }
 0x117   :  { %v478_v12 = vpop.f32.mrb[0].mxu0 }
 0x118   :  { %v2947_v16 = vadd.f32 %v3588_v11, %v478_v12  ;;  %v480_v19 = vpop.f32.mrb[1].mxu0 }
 0x119   :  { %v2949_v22 = vadd.f32 %v3590_v14, %v480_v19 }
 0x11a   :  { %v1857_v21 = vmul.f32 -1.442695, %v2947_v16 }
 0x11b   :  { %v1858_v27 = vmul.f32 -1.442695, %v2949_v22 }
 0x11c   :  { %2997 = vpow2.f32 %v1857_v21 }
 0x11d   :  { %v549_v28 = vpop.f32.mrb[8].mxu1  ;;  %2999 = vpow2.f32 %v1858_v27 }
 0x11e   :  { %v2129_v30 = vpop.f32.mrb[9].mxu1  ;;  %v550_v47 = vadd.f32 %v549_v28, %v3594_v36 }
 0x126   :  { %v2998_v31 = vpop.eup %2997 }
 0x127   :  { %v557_v33 = vadd.f32 1.0, %v2998_v31  ;;  %v3000_v38 = vpop.eup %2999 }
 0x128   :  { %v564_v42 = vadd.f32 1.0, %v3000_v38 }
 0x129   :  { %3001 = vrcp.f32 %v557_v33 }
 0x12a   :  { %3003 = vrcp.f32 %v564_v42 }
 0x133   :  { %v3002_v49 = vpop.eup %3001 }
 0x134   :  { %v567_v54 = vmul.f32 %v3002_v49, %v550_v47  ;;  %v3004_v60 = vpop.eup %3003 }
 0x135   :  { %v570_v63 = vsub.f32 1.0, %v3004_v60  ;;  %v572_v6 = vmul.f32 0.0, %v3004_v60 }
 0x136   :  { %v568_v58 = vadd.f32 %v567_v54, %v279_v52 }
 0x138   :  { %3005 = vtanh.f32 %v568_v58 }
 0x142   :  { %v3006_v0 = vpop.eup %3005 }
 0x143   :  { %v571_v5 = vmul.f32 %v3006_v0, %v570_v63 }
 0x145   :  { %v573_v7 = vadd.f32 %v572_v6, %v571_v5 }
 0x147   :  { %645 = vmatmul.mubr.f32.vlgmr.msra.gmra.mrb[2].mxu0 %v573_v7  ;;  %2163 = vmatmul.mubr.f32.vlgmr.msra.gmra.mrb[10].mxu1 %v573_v7 }
 0x148   :  { %2589 = vmatpush1.bf16.msra.mxu0 %v3293_v17  ;;  %2620 = vmatpush3.bf16.msra.mxu1 %v3362_v41 }
 0x149   :  { %2591 = vmatprep.subr.bf16.mxu0 %v3296_v18  ;;  %2621 = vmatprep.subr.bf16.mxu1 %v3080_v40 }
 0x14a   :  { %812 = vmatprep.mubr.f32.mxu0 %v3079_v3  ;;  %2197 = vmatprep.mubr.msk.f32.mxu1 %vm3081_vm0, %v3079_v3 }
 0x14c   :  { %2593 = vmatpush1.bf16.msra.mxu0 %v3316_v25  ;;  %2623 = vmatpush3.bf16.msra.mxu1 %v3393_v51 }
 0x14d   :  { %2595 = vmatprep.subr.bf16.mxu0 %v3319_v26  ;;  %2624 = vmatprep.subr.bf16.mxu1 %v3080_v40 }
 0x150   :  { %2597 = vmatpush1.bf16.msra.mxu0 %v3344_v34  ;;  %2626 = vmatpush3.bf16.msra.mxu1 %v3425_v61 }
 0x151   :  { %2599 = vmatprep.subr.bf16.mxu0 %v3347_v35  ;;  %2627 = vmatprep.subr.bf16.mxu1 %v3080_v40 }
 0x154   :  { %2601 = vmatpush1.bf16.msra.mxu0 %v3375_v45  ;;  %2629 = vmatpush3.bf16.msra.mxu1 %v3460_v10 }
 0x155   :  { %2603 = vmatprep.subr.bf16.mxu0 %v3378_v46  ;;  %2630 = vmatprep.subr.bf16.mxu1 %v3080_v40 }
 0x158   :  { %2605 = vmatpush1.bf16.msra.mxu0 %v3407_v55  ;;  %2632 = vmatpush3.bf16.msra.mxu1 %v3486_v20 }
 0x159   :  { %2607 = vmatprep.subr.bf16.mxu0 %v3410_v56  ;;  %2633 = vmatprep.subr.bf16.mxu1 %v3080_v40 }
 0x15c   :  { %2609 = vmatpush1.bf16.msra.mxu0 %v3439_v1  ;;  %2635 = vmatpush3.bf16.msra.mxu1 %v3503_v24 }
 0x15d   :  { %2611 = vmatprep.subr.bf16.mxu0 %v3445_v4  ;;  %2636 = vmatprep.subr.bf16.mxu1 %v3080_v40 }
 0x160   :  { %2613 = vmatpush1.bf16.msra.mxu0 %v3471_v13  ;;  %2638 = vmatpush3.bf16.msra.mxu1 %v3516_v29 }
 0x161   :  { %2615 = vmatprep.subr.bf16.mxu0 %v3477_v15  ;;  %2639 = vmatprep.subr.bf16.mxu1 %v3080_v40 }
 0x164   :  { %2617 = vmatpush1.bf16.msra.mxu0 %v3499_v23  ;;  %2641 = vmatpush3.bf16.msra.mxu1 %v3530_v32 }
 0x165   :  { %2643 = vmatprep.subr.bf16.mxu0 %v3273_v9  ;;  %2674 = vmatprep.subr.bf16.mxu1 %v3080_v40 }
 0x21a   :  { %v646_v37 = vpop.f32.mrb[2].mxu0  ;;  %v717_v39 = vpop.f32.mrb[10].mxu1 }
 0x21b   :  { %v2951_v44 = vadd.f32 %v3588_v11, %v646_v37  ;;  %v648_v59 = vpop.f32.mrb[3].mxu0  ;;  %v2164_v8 = vpop.f32.mrb[11].mxu1  ;;  %v718_v30 = vadd.f32 %v717_v39, %v3594_v36 }
 0x21c   :  { %v2953_v16 = vadd.f32 %v3590_v14, %v648_v59 }
 0x21d   :  { %v1859_v12 = vmul.f32 -1.442695, %v2951_v44 }
 0x21e   :  { %v1860_v19 = vmul.f32 -1.442695, %v2953_v16 }
 0x21f   :  { %3007 = vpow2.f32 %v1859_v12 }
 0x220   :  { %3009 = vpow2.f32 %v1860_v19 }
 0x229   :  { %v3008_v21 = vpop.eup %3007 }
 0x22a   :  { %v725_v22 = vadd.f32 1.0, %v3008_v21  ;;  %v3010_v27 = vpop.eup %3009 }
 0x22b   :  { %v732_v28 = vadd.f32 1.0, %v3010_v27 }
 0x22c   :  { %3011 = vrcp.f32 %v725_v22 }
 0x22d   :  { %3013 = vrcp.f32 %v732_v28 }
 0x236   :  { %v3012_v31 = vpop.eup %3011 }
 0x237   :  { %v735_v33 = vmul.f32 %v3012_v31, %v718_v30  ;;  %v3014_v42 = vpop.eup %3013 }
 0x238   :  { %v738_v47 = vsub.f32 1.0, %v3014_v42  ;;  %v740_v54 = vmul.f32 %v3014_v42, %v573_v7 }
 0x239   :  { %v736_v38 = vadd.f32 %v735_v33, %v3571_v43 }
 0x23b   :  { %3015 = vtanh.f32 %v736_v38 }
 0x245   :  { %v3016_v49 = vpop.eup %3015 }
 0x246   :  { %v739_v52 = vmul.f32 %v3016_v49, %v738_v47 }
 0x248   :  { %v741_v58 = vadd.f32 %v740_v54, %v739_v52 }
 0x24a   :  { %813 = vmatmul.mubr.f32.vlgmr.msra.gmra.mrb[4].mxu0 %v741_v58  ;;  %2198 = vmatmul.mubr.f32.vlgmr.msra.gmra.mrb[12].mxu1 %v741_v58 }
 0x24b   :  { %2645 = vmatpush1.bf16.msra.mxu0 %v3293_v17  ;;  %2676 = vmatpush3.bf16.msra.mxu1 %v3362_v41 }
 0x24c   :  { %2647 = vmatprep.subr.bf16.mxu0 %v3296_v18  ;;  %2677 = vmatprep.subr.bf16.mxu1 %v3080_v40 }
 0x24d   :  { %980 = vmatprep.mubr.f32.mxu0 %v3079_v3  ;;  %2232 = vmatprep.mubr.msk.f32.mxu1 %vm3081_vm0, %v3079_v3 }
 0x24f   :  { %2649 = vmatpush1.bf16.msra.mxu0 %v3316_v25  ;;  %2679 = vmatpush3.bf16.msra.mxu1 %v3393_v51 }
 0x250   :  { %2651 = vmatprep.subr.bf16.mxu0 %v3319_v26  ;;  %2680 = vmatprep.subr.bf16.mxu1 %v3080_v40 }
 0x253   :  { %2653 = vmatpush1.bf16.msra.mxu0 %v3344_v34  ;;  %2682 = vmatpush3.bf16.msra.mxu1 %v3425_v61 }
 0x254   :  { %2655 = vmatprep.subr.bf16.mxu0 %v3347_v35  ;;  %2683 = vmatprep.subr.bf16.mxu1 %v3080_v40 }
 0x257   :  { %2657 = vmatpush1.bf16.msra.mxu0 %v3375_v45  ;;  %2685 = vmatpush3.bf16.msra.mxu1 %v3460_v10 }
 0x258   :  { %2659 = vmatprep.subr.bf16.mxu0 %v3378_v46  ;;  %2686 = vmatprep.subr.bf16.mxu1 %v3080_v40 }
 0x25b   :  { %2661 = vmatpush1.bf16.msra.mxu0 %v3407_v55  ;;  %2688 = vmatpush3.bf16.msra.mxu1 %v3486_v20 }
 0x25c   :  { %2663 = vmatprep.subr.bf16.mxu0 %v3410_v56  ;;  %2689 = vmatprep.subr.bf16.mxu1 %v3080_v40 }
 0x25f   :  { %2665 = vmatpush1.bf16.msra.mxu0 %v3439_v1  ;;  %2691 = vmatpush3.bf16.msra.mxu1 %v3503_v24 }
 0x260   :  { %2667 = vmatprep.subr.bf16.mxu0 %v3445_v4  ;;  %2692 = vmatprep.subr.bf16.mxu1 %v3080_v40 }
 0x263   :  { %2669 = vmatpush1.bf16.msra.mxu0 %v3471_v13  ;;  %2694 = vmatpush3.bf16.msra.mxu1 %v3516_v29 }
 0x264   :  { %2671 = vmatprep.subr.bf16.mxu0 %v3477_v15  ;;  %2695 = vmatprep.subr.bf16.mxu1 %v3080_v40 }
 0x267   :  { %2673 = vmatpush1.bf16.msra.mxu0 %v3499_v23  ;;  %2697 = vmatpush3.bf16.msra.mxu1 %v3530_v32 }
 0x268   :  { %2699 = vmatprep.subr.bf16.mxu0 %v3273_v9  ;;  %2730 = vmatprep.subr.bf16.mxu1 %v3080_v40 }
 0x31d   :  { %v814_v43 = vpop.f32.mrb[4].mxu0  ;;  %v885_v60 = vpop.f32.mrb[12].mxu1 }
 0x31e   :  { %v2955_v63 = vadd.f32 %v3588_v11, %v814_v43  ;;  %v816_v0 = vpop.f32.mrb[5].mxu0  ;;  %v2199_v5 = vpop.f32.mrb[13].mxu1  ;;  %v886_v12 = vadd.f32 %v885_v60, %v3594_v36 }
 0x31f   :  { %v2957_v7 = vadd.f32 %v3590_v14, %v816_v0 }
 0x320   :  { %v1861_v6 = vmul.f32 -1.442695, %v2955_v63 }
 0x321   :  { %v1862_v37 = vmul.f32 -1.442695, %v2957_v7 }
 0x322   :  { %3017 = vpow2.f32 %v1861_v6 }
 0x323   :  { %3019 = vpow2.f32 %v1862_v37 }
 0x32c   :  { %v3018_v39 = vpop.eup %3017 }
 0x32d   :  { %v893_v44 = vadd.f32 1.0, %v3018_v39  ;;  %v3020_v59 = vpop.eup %3019 }
 0x32e   :  { %v900_v8 = vadd.f32 1.0, %v3020_v59 }
 0x32f   :  { %3021 = vrcp.f32 %v893_v44 }
 0x330   :  { %3023 = vrcp.f32 %v900_v8 }
 0x339   :  { %v3022_v16 = vpop.eup %3021 }
 0x33a   :  { %v903_v19 = vmul.f32 %v3022_v16, %v886_v12  ;;  %v3024_v22 = vpop.eup %3023 }
 0x33b   :  { %v906_v27 = vsub.f32 1.0, %v3024_v22  ;;  %v908_v31 = vmul.f32 %v3024_v22, %v741_v58 }
 0x33c   :  { %v904_v21 = vadd.f32 %v903_v19, %v3575_v50 }
 0x33e   :  { %3025 = vtanh.f32 %v904_v21 }
 0x348   :  { %v3026_v28 = vpop.eup %3025 }
 0x349   :  { %v907_v30 = vmul.f32 %v3026_v28, %v906_v27 }
 0x34b   :  { %v909_v33 = vadd.f32 %v908_v31, %v907_v30 }
 0x34d   :  { %981 = vmatmul.mubr.f32.vlgmr.msra.gmra.mrb[6].mxu0 %v909_v33  ;;  %2233 = vmatmul.mubr.f32.vlgmr.msra.gmra.mrb[14].mxu1 %v909_v33 }
 0x34e   :  { %2701 = vmatpush1.bf16.msra.mxu0 %v3293_v17  ;;  %2732 = vmatpush3.bf16.msra.mxu1 %v3362_v41 }
 0x34f   :  { %2703 = vmatprep.subr.bf16.mxu0 %v3296_v18  ;;  %2733 = vmatprep.subr.bf16.mxu1 %v3080_v40 }
 0x350   :  { %1148 = vmatprep.mubr.f32.mxu0 %v3079_v3  ;;  %2267 = vmatprep.mubr.msk.f32.mxu1 %vm3081_vm0, %v3079_v3 }
 0x352   :  { %2705 = vmatpush1.bf16.msra.mxu0 %v3316_v25  ;;  %2735 = vmatpush3.bf16.msra.mxu1 %v3393_v51 }
 0x353   :  { %2707 = vmatprep.subr.bf16.mxu0 %v3319_v26  ;;  %2736 = vmatprep.subr.bf16.mxu1 %v3080_v40 }
 0x356   :  { %2709 = vmatpush1.bf16.msra.mxu0 %v3344_v34  ;;  %2738 = vmatpush3.bf16.msra.mxu1 %v3425_v61 }
 0x357   :  { %2711 = vmatprep.subr.bf16.mxu0 %v3347_v35  ;;  %2739 = vmatprep.subr.bf16.mxu1 %v3080_v40 }
 0x35a   :  { %2713 = vmatpush1.bf16.msra.mxu0 %v3375_v45  ;;  %2741 = vmatpush3.bf16.msra.mxu1 %v3460_v10 }
 0x35b   :  { %2715 = vmatprep.subr.bf16.mxu0 %v3378_v46  ;;  %2742 = vmatprep.subr.bf16.mxu1 %v3080_v40 }
 0x35e   :  { %2717 = vmatpush1.bf16.msra.mxu0 %v3407_v55  ;;  %2744 = vmatpush3.bf16.msra.mxu1 %v3486_v20 }
 0x35f   :  { %2719 = vmatprep.subr.bf16.mxu0 %v3410_v56  ;;  %2745 = vmatprep.subr.bf16.mxu1 %v3080_v40 }
 0x362   :  { %2721 = vmatpush1.bf16.msra.mxu0 %v3439_v1  ;;  %2747 = vmatpush3.bf16.msra.mxu1 %v3503_v24 }
 0x363   :  { %2723 = vmatprep.subr.bf16.mxu0 %v3445_v4  ;;  %2748 = vmatprep.subr.bf16.mxu1 %v3080_v40 }
 0x366   :  { %2725 = vmatpush1.bf16.msra.mxu0 %v3471_v13  ;;  %2750 = vmatpush3.bf16.msra.mxu1 %v3516_v29 }
 0x367   :  { %2727 = vmatprep.subr.bf16.mxu0 %v3477_v15  ;;  %2751 = vmatprep.subr.bf16.mxu1 %v3080_v40 }
 0x36a   :  { %2729 = vmatpush1.bf16.msra.mxu0 %v3499_v23  ;;  %2753 = vmatpush3.bf16.msra.mxu1 %v3530_v32 }
 0x36b   :  { %2755 = vmatprep.subr.bf16.mxu0 %v3273_v9  ;;  %2786 = vmatprep.subr.bf16.mxu1 %v3080_v40 }
 0x420   :  { %v982_v50 = vpop.f32.mrb[6].mxu0  ;;  %v1053_v38 = vpop.f32.mrb[14].mxu1 }
 0x421   :  { %v2959_v42 = vadd.f32 %v3588_v11, %v982_v50  ;;  %v984_v47 = vpop.f32.mrb[7].mxu0  ;;  %v2234_v49 = vpop.f32.mrb[15].mxu1  ;;  %v1054_v5 = vadd.f32 %v1053_v38, %v3594_v36 }
 0x422   :  { %v2961_v54 = vadd.f32 %v3590_v14, %v984_v47 }
 0x423   :  { %v1863_v52 = vmul.f32 -1.442695, %v2959_v42 }
 0x424   :  { %v1864_v58 = vmul.f32 -1.442695, %v2961_v54 }
 0x425   :  { %3027 = vpow2.f32 %v1863_v52 }
 0x426   :  { %3029 = vpow2.f32 %v1864_v58 }
 0x42f   :  { %v3028_v43 = vpop.eup %3027 }
 0x430   :  { %v1061_v60 = vadd.f32 1.0, %v3028_v43  ;;  %v3030_v63 = vpop.eup %3029 }
 0x431   :  { %v1068_v0 = vadd.f32 1.0, %v3030_v63 }
 0x432   :  { %3031 = vrcp.f32 %v1061_v60 }
 0x433   :  { %3033 = vrcp.f32 %v1068_v0 }
 0x43c   :  { %v3032_v6 = vpop.eup %3031 }
 0x43d   :  { %v1071_v7 = vmul.f32 %v3032_v6, %v1054_v5  ;;  %v3034_v39 = vpop.eup %3033 }
 0x43e   :  { %v1074_v44 = vsub.f32 1.0, %v3034_v39  ;;  %v1076_v12 = vmul.f32 %v3034_v39, %v909_v33 }
 0x43f   :  { %v1072_v37 = vadd.f32 %v1071_v7, %v3573_v48 }
 0x441   :  { %3035 = vtanh.f32 %v1072_v37 }
 0x44b   :  { %v3036_v59 = vpop.eup %3035 }
 0x44c   :  { %v1075_v8 = vmul.f32 %v3036_v59, %v1074_v44 }
 0x44e   :  { %v1077_v16 = vadd.f32 %v1076_v12, %v1075_v8 }
 0x450   :  { %1149 = vmatmul.mubr.f32.vlgmr.msra.gmra.mrb[8].mxu0 %v1077_v16  ;;  %2268 = vmatmul.mubr.f32.vlgmr.msra.gmra.mrb[16].mxu1 %v1077_v16 }
 0x451   :  { %2757 = vmatpush1.bf16.msra.mxu0 %v3293_v17  ;;  %2788 = vmatpush3.bf16.msra.mxu1 %v3362_v41 }
 0x452   :  { %2759 = vmatprep.subr.bf16.mxu0 %v3296_v18  ;;  %2789 = vmatprep.subr.bf16.mxu1 %v3080_v40 }
 0x453   :  { %1316 = vmatprep.mubr.f32.mxu0 %v3079_v3  ;;  %2302 = vmatprep.mubr.msk.f32.mxu1 %vm3081_vm0, %v3079_v3 }
 0x455   :  { %2761 = vmatpush1.bf16.msra.mxu0 %v3316_v25  ;;  %2791 = vmatpush3.bf16.msra.mxu1 %v3393_v51 }
 0x456   :  { %2763 = vmatprep.subr.bf16.mxu0 %v3319_v26  ;;  %2792 = vmatprep.subr.bf16.mxu1 %v3080_v40 }
 0x459   :  { %2765 = vmatpush1.bf16.msra.mxu0 %v3344_v34  ;;  %2794 = vmatpush3.bf16.msra.mxu1 %v3425_v61 }
 0x45a   :  { %2767 = vmatprep.subr.bf16.mxu0 %v3347_v35  ;;  %2795 = vmatprep.subr.bf16.mxu1 %v3080_v40 }
 0x45d   :  { %2769 = vmatpush1.bf16.msra.mxu0 %v3375_v45  ;;  %2797 = vmatpush3.bf16.msra.mxu1 %v3460_v10 }
 0x45e   :  { %2771 = vmatprep.subr.bf16.mxu0 %v3378_v46  ;;  %2798 = vmatprep.subr.bf16.mxu1 %v3080_v40 }
 0x461   :  { %2773 = vmatpush1.bf16.msra.mxu0 %v3407_v55  ;;  %2800 = vmatpush3.bf16.msra.mxu1 %v3486_v20 }
 0x462   :  { %2775 = vmatprep.subr.bf16.mxu0 %v3410_v56  ;;  %2801 = vmatprep.subr.bf16.mxu1 %v3080_v40 }
 0x465   :  { %2777 = vmatpush1.bf16.msra.mxu0 %v3439_v1  ;;  %2803 = vmatpush3.bf16.msra.mxu1 %v3503_v24 }
 0x466   :  { %2779 = vmatprep.subr.bf16.mxu0 %v3445_v4  ;;  %2804 = vmatprep.subr.bf16.mxu1 %v3080_v40 }
 0x469   :  { %2781 = vmatpush1.bf16.msra.mxu0 %v3471_v13  ;;  %2806 = vmatpush3.bf16.msra.mxu1 %v3516_v29 }
 0x46a   :  { %2783 = vmatprep.subr.bf16.mxu0 %v3477_v15  ;;  %2807 = vmatprep.subr.bf16.mxu1 %v3080_v40 }
 0x46d   :  { %2785 = vmatpush1.bf16.msra.mxu0 %v3499_v23  ;;  %2809 = vmatpush3.bf16.msra.mxu1 %v3530_v32 }
 0x46e   :  { %2811 = vmatprep.subr.bf16.mxu0 %v3273_v9  ;;  %2842 = vmatprep.subr.bf16.mxu1 %v3080_v40 }
 0x523   :  { %v1150_v48 = vpop.f32.mrb[8].mxu0  ;;  %v1221_v19 = vpop.f32.mrb[16].mxu1 }
 0x524   :  { %v2963_v21 = vadd.f32 %v3588_v11, %v1150_v48  ;;  %v1152_v22 = vpop.f32.mrb[9].mxu0  ;;  %v2269_v27 = vpop.f32.mrb[17].mxu1  ;;  %v1222_v47 = vadd.f32 %v1221_v19, %v3594_v36 }
 0x525   :  { %v2965_v30 = vadd.f32 %v3590_v14, %v1152_v22 }
 0x526   :  { %v1865_v28 = vmul.f32 -1.442695, %v2963_v21 }
 0x527   :  { %v1866_v31 = vmul.f32 -1.442695, %v2965_v30 }
 0x528   :  { %3037 = vpow2.f32 %v1865_v28 }
 0x529   :  { %3039 = vpow2.f32 %v1866_v31 }
 0x532   :  { %v3038_v33 = vpop.eup %3037 }
 0x533   :  { %v1229_v50 = vadd.f32 1.0, %v3038_v33  ;;  %v3040_v38 = vpop.eup %3039 }
 0x534   :  { %v1236_v42 = vadd.f32 1.0, %v3040_v38 }
 0x535   :  { %3041 = vrcp.f32 %v1229_v50 }
 0x536   :  { %3043 = vrcp.f32 %v1236_v42  ;;  %v1752_v42 = vld [vmem:[%s3907_s5 + $0x10] sm:$0xff] }
 0x53f   :  { %v3042_v49 = vpop.eup %3041 }
 0x540   :  { %v1239_v52 = vmul.f32 %v3042_v49, %v1222_v47  ;;  %v3044_v58 = vpop.eup %3043  ;;  %v1754_v49 = vld [vmem:[%s3907_s5 + $0x20] sm:$0xff] }
 0x541   :  { %v1242_v43 = vsub.f32 1.0, %v3044_v58  ;;  %v1244_v0 = vmul.f32 %v3044_v58, %v1077_v16  ;;  %v1756_v58 = vld [vmem:[%s3907_s5 + $0x30] sm:$0xff] }
 0x542   :  { %v1240_v54 = vadd.f32 %v1239_v52, %v3579_v57  ;;  %v1755_v52 = vld [vmem:[%s3907_s5 + $0x28] sm:$0xff] }
 0x544   :  { %3045 = vtanh.f32 %v1240_v54  ;;  %v2929_v54 = vpack.c.bf16 %v1755_v52, %v1754_v49 }
 0x54e   :  { %v3046_v60 = vpop.eup %3045 }
 0x54f   :  { %v1243_v63 = vmul.f32 %v3046_v60, %v1242_v43  ;;  %v1757_v43 = vld [vmem:[%s3907_s5 + $0x38] sm:$0xff] }
 0x550   :  { %v2932_v60 = vpack.c.bf16 %v1757_v43, %v1756_v58 }
 0x551   :  { %v1245_v5 = vadd.f32 %v1244_v0, %v1243_v63  ;;  %v1758_v63 = vld [vmem:[%s3907_s5 + $0x40] sm:$0xff]  ;;  %v1759_v0 = vld [vmem:[%s3907_s5 + $0x48] sm:$0xff] }
 0x553   :  { %1317 = vmatmul.mubr.f32.vlgmr.msra.gmra.mrb[10].mxu0 %v1245_v5  ;;  %2303 = vmatmul.mubr.f32.vlgmr.msra.gmra.mrb[18].mxu1 %v1245_v5 }
 0x554   :  { %2813 = vmatpush1.bf16.msra.mxu0 %v3293_v17  ;;  %2844 = vmatpush3.bf16.msra.mxu1 %v3362_v41 }
 0x555   :  { %2815 = vmatprep.subr.bf16.mxu0 %v3296_v18  ;;  %2845 = vmatprep.subr.bf16.mxu1 %v3080_v40 }
 0x556   :  { %1484 = vmatprep.mubr.f32.mxu0 %v3079_v3  ;;  %2337 = vmatprep.mubr.msk.f32.mxu1 %vm3081_vm0, %v3079_v3 }
 0x558   :  { %2817 = vmatpush1.bf16.msra.mxu0 %v3316_v25  ;;  %2847 = vmatpush3.bf16.msra.mxu1 %v3393_v51 }
 0x559   :  { %2819 = vmatprep.subr.bf16.mxu0 %v3319_v26  ;;  %2848 = vmatprep.subr.bf16.mxu1 %v3080_v40 }
 0x55c   :  { %2821 = vmatpush1.bf16.msra.mxu0 %v3344_v34  ;;  %2850 = vmatpush3.bf16.msra.mxu1 %v3425_v61 }
 0x55d   :  { %2823 = vmatprep.subr.bf16.mxu0 %v3347_v35  ;;  %2851 = vmatprep.subr.bf16.mxu1 %v3080_v40 }
 0x560   :  { %2825 = vmatpush1.bf16.msra.mxu0 %v3375_v45  ;;  %2853 = vmatpush3.bf16.msra.mxu1 %v3460_v10 }
 0x561   :  { %2827 = vmatprep.subr.bf16.mxu0 %v3378_v46  ;;  %2854 = vmatprep.subr.bf16.mxu1 %v3080_v40 }
 0x564   :  { %2829 = vmatpush1.bf16.msra.mxu0 %v3407_v55  ;;  %2856 = vmatpush3.bf16.msra.mxu1 %v3486_v20 }
 0x565   :  { %2831 = vmatprep.subr.bf16.mxu0 %v3410_v56  ;;  %2857 = vmatprep.subr.bf16.mxu1 %v3080_v40 }
 0x568   :  { %2833 = vmatpush1.bf16.msra.mxu0 %v3439_v1  ;;  %2859 = vmatpush3.bf16.msra.mxu1 %v3503_v24 }
 0x569   :  { %2835 = vmatprep.subr.bf16.mxu0 %v3445_v4  ;;  %2860 = vmatprep.subr.bf16.mxu1 %v3080_v40 }
 0x56c   :  { %2837 = vmatpush1.bf16.msra.mxu0 %v3471_v13  ;;  %2862 = vmatpush3.bf16.msra.mxu1 %v3516_v29 }
 0x56d   :  { %2839 = vmatprep.subr.bf16.mxu0 %v3477_v15  ;;  %2863 = vmatprep.subr.bf16.mxu1 %v3080_v40 }
 0x570   :  { %2841 = vmatpush1.bf16.msra.mxu0 %v3499_v23  ;;  %2865 = vmatpush3.bf16.msra.mxu1 %v3530_v32 }
 0x571   :  { %2867 = vmatprep.subr.bf16.mxu0 %v3273_v9  ;;  %2898 = vmatprep.subr.bf16.mxu1 %v3080_v40 }
 0x626   :  { %v1318_v57 = vpop.f32.mrb[10].mxu0  ;;  %v1389_v6 = vpop.f32.mrb[18].mxu1 }
 0x627   :  { %v2967_v7 = vadd.f32 %v3588_v11, %v1318_v57  ;;  %v1320_v37 = vpop.f32.mrb[11].mxu0  ;;  %v2304_v39 = vpop.f32.mrb[19].mxu1  ;;  %v1390_v9 = vadd.f32 %v1389_v6, %v3594_v36  ;;  %v1760_v57 = vld [vmem:[%s3907_s5 + $0x50] sm:$0xff]  ;;  %v1761_v6 = vld [vmem:[%s3907_s5 + $0x58] sm:$0xff] }
 0x628   :  { %v2969_v59 = vadd.f32 %v3590_v14, %v1320_v37  ;;  %v1762_v37 = vld [vmem:[%s3907_s5 + $0x60] sm:$0xff]  ;;  %v1763_v39 = vld [vmem:[%s3907_s5 + $0x68] sm:$0xff] }
 0x629   :  { %v1867_v44 = vmul.f32 -1.442695, %v2967_v7  ;;  %v2938_v7 = vpack.c.bf16 %v1761_v6, %v1760_v57 }
 0x62a   :  { %v1868_v8 = vmul.f32 -1.442695, %v2969_v59  ;;  %v1764_v59 = vld [vmem:[%s3907_s5 + $0x70] sm:$0xff] }
 0x62b   :  { %3047 = vpow2.f32 %v1867_v44  ;;  %v2941_v44 = vpack.c.bf16 %v1763_v39, %v1762_v37 }
 0x62c   :  { %3049 = vpow2.f32 %v1868_v8  ;;  %v1765_v8 = vld [vmem:[%s3907_s5 + $0x78] sm:$0xff] }
 0x635   :  { %v3048_v12 = vpop.eup %3047 }
 0x636   :  { %v1397_v16 = vadd.f32 1.0, %v3048_v12  ;;  %v3050_v48 = vpop.eup %3049  ;;  %v2944_v12 = vpack.c.bf16 %v1765_v8, %v1764_v59 }
 0x637   :  { %v1404_v19 = vadd.f32 1.0, %v3050_v48 }
 0x638   :  { %3051 = vrcp.f32 %v1397_v16 }
 0x639   :  { %3053 = vrcp.f32 %v1404_v19 }
 0x642   :  { %v3052_v21 = vpop.eup %3051 }
 0x643   :  { %v1407_v22 = vmul.f32 %v3052_v21, %v1390_v9  ;;  %v3054_v28 = vpop.eup %3053 }
 0x644   :  { %v1410_v30 = vsub.f32 1.0, %v3054_v28  ;;  %v1412_v50 = vmul.f32 %v3054_v28, %v1245_v5  ;;  %v2935_v5 = vpack.c.bf16 %v1759_v0, %v1758_v63 }
 0x645   :  { %v1408_v27 = vadd.f32 %v1407_v22, %v3577_v53  ;;  %v1751_v53 = vld [vmem:[%s3907_s5 + $0x8] sm:$0xff] }
 0x647   :  { %3055 = vtanh.f32 %v1408_v27 }
 0x651   :  { %v3056_v31 = vpop.eup %3055 }
 0x652   :  { %v1411_v33 = vmul.f32 %v3056_v31, %v1410_v30 }
 0x654   :  { %v1413_v38 = vadd.f32 %v1412_v50, %v1411_v33 }
 0x656   :  { %1485 = vmatmul.mubr.f32.vlgmr.msra.gmra.mrb[12].mxu0 %v1413_v38  ;;  %2338 = vmatmul.mubr.f32.vlgmr.msra.gmra.mrb[20].mxu1 %v1413_v38 }
 0x657   :  { %2869 = vmatpush1.bf16.msra.mxu0 %v3293_v17  ;;  %2900 = vmatpush3.bf16.msra.mxu1 %v3362_v41 }
 0x658   :  { %2871 = vmatprep.subr.bf16.mxu0 %v3296_v18  ;;  %2901 = vmatprep.subr.bf16.mxu1 %v3080_v40 }
 0x659   :  { %1652 = vmatprep.mubr.f32.mxu0 %v3079_v3  ;;  %2372 = vmatprep.mubr.msk.f32.mxu1 %vm3081_vm0, %v3079_v3 }
 0x65b   :  { %2873 = vmatpush1.bf16.msra.mxu0 %v3316_v25  ;;  %2903 = vmatpush3.bf16.msra.mxu1 %v3393_v51 }
 0x65c   :  { %2875 = vmatprep.subr.bf16.mxu0 %v3319_v26  ;;  %2904 = vmatprep.subr.bf16.mxu1 %v3080_v40 }
 0x65f   :  { %2877 = vmatpush1.bf16.msra.mxu0 %v3344_v34  ;;  %2906 = vmatpush3.bf16.msra.mxu1 %v3425_v61 }
 0x660   :  { %2879 = vmatprep.subr.bf16.mxu0 %v3347_v35  ;;  %2907 = vmatprep.subr.bf16.mxu1 %v3080_v40 }
 0x663   :  { %2881 = vmatpush1.bf16.msra.mxu0 %v3375_v45  ;;  %2909 = vmatpush3.bf16.msra.mxu1 %v3460_v10 }
 0x664   :  { %2883 = vmatprep.subr.bf16.mxu0 %v3378_v46  ;;  %2910 = vmatprep.subr.bf16.mxu1 %v3080_v40 }
 0x667   :  { %2885 = vmatpush1.bf16.msra.mxu0 %v3407_v55  ;;  %2912 = vmatpush3.bf16.msra.mxu1 %v3486_v20 }
 0x668   :  { %2887 = vmatprep.subr.bf16.mxu0 %v3410_v56  ;;  %2913 = vmatprep.subr.bf16.mxu1 %v3080_v40 }
 0x66b   :  { %2889 = vmatpush1.bf16.msra.mxu0 %v3439_v1  ;;  %2915 = vmatpush3.bf16.msra.mxu1 %v3503_v24 }
 0x66c   :  { %2891 = vmatprep.subr.bf16.mxu0 %v3445_v4  ;;  %2916 = vmatprep.subr.bf16.mxu1 %v3080_v40 }
 0x66f   :  { %2893 = vmatpush1.bf16.msra.mxu0 %v3471_v13  ;;  %2918 = vmatpush3.bf16.msra.mxu1 %v3516_v29 }
 0x670   :  { %2895 = vmatprep.subr.bf16.mxu0 %v3477_v15  ;;  %2919 = vmatprep.subr.bf16.mxu1 %v3080_v40 }
 0x673   :  { %2897 = vmatpush1.bf16.msra.mxu0 %v3499_v23  ;;  %2921 = vmatpush3.bf16.msra.mxu1 %v3530_v32  ;;  %v1750_v32 = vld [vmem:[%s3907_s5] sm:$0xff] }
 0x674   :  { %2922 = vmatprep.subr.bf16.mxu0 %v3080_v40 }
 0x729   :  { %v1486_v17 = vpop.f32.mrb[12].mxu0  ;;  %v1557_v18 = vpop.f32.mrb[20].mxu1 }
 0x72a   :  { %v2971_v25 = vadd.f32 %v3588_v11, %v1486_v17  ;;  %v1488_v26 = vpop.f32.mrb[13].mxu0  ;;  %v2339_v34 = vpop.f32.mrb[21].mxu1  ;;  %v1558_v61 = vadd.f32 %v1557_v18, %v3594_v36 }
 0x72b   :  { %v2973_v41 = vadd.f32 %v3590_v14, %v1488_v26 }
 0x72c   :  { %v1869_v35 = vmul.f32 -1.442695, %v2971_v25 }
 0x72d   :  { %v1870_v45 = vmul.f32 -1.442695, %v2973_v41  ;;  %v1873_v41 = vld [vmem:[%s3908_s6] ss:$0 sm:$0xff] }
 0x72e   :  { %3057 = vpow2.f32 %v1869_v35 }
 0x72f   :  { %3059 = vpow2.f32 %v1870_v45 }
 0x738   :  { %v3058_v46 = vpop.eup %3057 }
 0x739   :  { %v1565_v51 = vadd.f32 1.0, %v3058_v46  ;;  %v3060_v55 = vpop.eup %3059 }
 0x73a   :  { %v1572_v56 = vadd.f32 1.0, %v3060_v55 }
 0x73b   :  { %3061 = vrcp.f32 %v1565_v51 }
 0x73c   :  { %3063 = vrcp.f32 %v1572_v56 }
 0x745   :  { %v3062_v1 = vpop.eup %3061 }
 0x746   :  { %v1575_v4 = vmul.f32 %v3062_v1, %v1558_v61  ;;  %v3064_v13 = vpop.eup %3063 }
 0x747   :  { %v1578_v15 = vsub.f32 1.0, %v3064_v13  ;;  %v1580_v24 = vmul.f32 %v3064_v13, %v1413_v38 }
 0x748   :  { %v1576_v10 = vadd.f32 %v1575_v4, %v3586_v2  ;;  %v2923_v2 = vpack.c.bf16 %v1751_v53, %v1750_v32 }
 0x74a   :  { %3065 = vtanh.f32 %v1576_v10 }
 0x754   :  { %v3066_v20 = vpop.eup %3065 }
 0x755   :  { %v1579_v23 = vmul.f32 %v3066_v20, %v1578_v15 }
 0x757   :  { %v3830_v29 = vadd.f32 %v1580_v24, %v1579_v23 }
 0x759   :  { %1653 = vmatmul.mubr.f32.vlgmr.msra.gmra.mrb[14].mxu0 %v3830_v29  ;;  %2373 = vmatmul.mubr.f32.vlgmr.msra.gmra.mrb[22].mxu1 %v3830_v29 }
 0x75a   :  { %2407 = vmatprep.mubr.msk.f32.mxu0 %vm3081_vm0, %v3079_v3  ;;  %2924 = vmatpush3.bf16.msra.mxu0 %v2923_v2  ;;  %v1753_v3 = vld [vmem:[%s3907_s5 + $0x18] sm:$0xff] }
 0x75b   :  { %2925 = vmatprep.subr.bf16.mxu0 %v3080_v40  ;;  %v2926_v47 = vpack.c.bf16 %v1753_v3, %v1752_v42 }
 0x75e   :  { %2927 = vmatpush3.bf16.msra.mxu0 %v2926_v47 }
 0x75f   :  { %2928 = vmatprep.subr.bf16.mxu0 %v3080_v40 }
 0x762   :  { %2930 = vmatpush3.bf16.msra.mxu0 %v2929_v54 }
 0x763   :  { %2931 = vmatprep.subr.bf16.mxu0 %v3080_v40 }
 0x766   :  { %2933 = vmatpush3.bf16.msra.mxu0 %v2932_v60 }
 0x767   :  { %2934 = vmatprep.subr.bf16.mxu0 %v3080_v40 }
 0x76a   :  { %2936 = vmatpush3.bf16.msra.mxu0 %v2935_v5 }
 0x76b   :  { %2937 = vmatprep.subr.bf16.mxu0 %v3080_v40 }
 0x76e   :  { %2939 = vmatpush3.bf16.msra.mxu0 %v2938_v7 }
 0x76f   :  { %2940 = vmatprep.subr.bf16.mxu0 %v3080_v40 }
 0x772   :  { %2942 = vmatpush3.bf16.msra.mxu0 %v2941_v44 }
 0x773   :  { %2943 = vmatprep.subr.bf16.mxu0 %v3080_v40 }
 0x776   :  { %2945 = vmatpush3.bf16.msra.mxu0 %v2944_v12 }
 0x82c   :  { %v1654_v16 = vpop.f32.mrb[14].mxu0  ;;  %v1725_v48 = vpop.f32.mrb[22].mxu1 }
 0x82d   :  { %v2975_v19 = vadd.f32 %v3588_v11, %v1654_v16  ;;  %v1656_v9 = vpop.f32.mrb[15].mxu0  ;;  %v2374_v21 = vpop.f32.mrb[23].mxu1  ;;  %v1726_v40 = vadd.f32 %v1725_v48, %v3594_v36 }
 0x82e   :  { %v2977_v27 = vadd.f32 %v3590_v14, %v1656_v9 }
 0x82f   :  { %v1871_v22 = vmul.f32 -1.442695, %v2975_v19 }
 0x830   :  { %v1872_v28 = vmul.f32 -1.442695, %v2977_v27 }
 0x831   :  { %3067 = vpow2.f32 %v1871_v22 }
 0x832   :  { %3069 = vpow2.f32 %v1872_v28 }
 0x83b   :  { %v3068_v30 = vpop.eup %3067 }
 0x83c   :  { %v1733_v31 = vadd.f32 1.0, %v3068_v30  ;;  %v3070_v33 = vpop.eup %3069 }
 0x83d   :  { %v1740_v50 = vadd.f32 1.0, %v3070_v33 }
 0x83e   :  { %3071 = vrcp.f32 %v1733_v31 }
 0x83f   :  { %3073 = vrcp.f32 %v1740_v50 }
 0x848   :  { %v3072_v38 = vpop.eup %3071 }
 0x849   :  { %v1743_v17 = vmul.f32 %v3072_v38, %v1726_v40  ;;  %v3074_v18 = vpop.eup %3073 }
 0x84a   :  { %v1746_v25 = vsub.f32 1.0, %v3074_v18  ;;  %v1748_v34 = vmul.f32 %v3074_v18, %v3830_v29 }
 0x84b   :  { %v1744_v11 = vadd.f32 %v1743_v17, %v3584_v62 }
 0x84d   :  { %3075 = vtanh.f32 %v1744_v11 }
 0x857   :  { %v3076_v26 = vpop.eup %3075 }
 0x858   :  { %v1747_v14 = vmul.f32 %v3076_v26, %v1746_v25 }
 0x85a   :  { %v1749_v35 = vadd.f32 %v1748_v34, %v1747_v14 }
 0x85c   :  { %2408 = vmatmul.mubr.f32.vlgmr.msra.gmra.mrb[16].mxu0 %v1749_v35 }
 0x92f   :  { %v1839_v45 = vpop.f32.mrb[16].mxu0 }
 0x930   :  { %v1840_v36 = vadd.f32 %v1873_v41, %v1839_v45  ;;  %v2409_v46 = vpop.f32.mrb[17].mxu0 }
 0x932   :  { %v1843_v51 = vmul.f32 1.442695, %v1840_v36 }
 0x934   :  { %3077 = vpow2.f32 %v1843_v51 }
 0x93e   :  { %v3078_v55 = vpop.eup %3077 }
 0x93f   :  { %1845 = vst [vmem:[%s3909_s7] sm:$0xff] %v3078_v55 }

</bundles_post_ra>
